<compile_context>
chip_gen: v7x
topology: tpu7x:2x2x1
jax: 0.10.0
libtpu: 0.0.40
codegen_flags: <defaults>
</compile_context>

<pallas_src>
import numpy as np
import jax
import jax.numpy as jnp
from jax import lax
from jax.experimental import pallas as pl
from jax.experimental.pallas import tpu as pltpu

NUM_LAYERS = 4
HIDDEN = 75          # backbone input_dim == hidden_dim == 75 (real features)
OUTPUT_DIM = 4       # finetuning head output_dim (small, synthetic)
LN_EPS = 1e-5
DP = 128             # lane-padded feature / logits width


def _round_up(v, m):
    return (v + m - 1) // m * m


def _gcn_kernel(x_ref, adj_ref, pool_ref, invc_ref,
                w1_ref, b1_ref, w2_ref, b2_ref,
                lng_ref, lnb_ref,
                wp1_ref, bp1_ref, wp2_ref, bp2_ref,
                emb_ref, out_ref):
    x = x_ref[...]                               # (npg, 128) bf16, padded lanes/rows are zero
    adj = adj_ref[...]                           # (npg, npg) bf16; already contains +I (GIN eps=0)

    # Lane mask for the 75 real features (hoisted out of the layer loop; JAX won't CSE it).
    feat_mask = (lax.broadcasted_iota(jnp.int32, (1, DP), 1) < HIDDEN).astype(jnp.float32)

    emb = None
    for l in range(NUM_LAYERS):
        # GINConv (eps = 0): MLP((I + A) @ x); the +I is folded into adj in the wrapper.
        agg = jnp.dot(adj, x, preferred_element_type=jnp.float32)
        h = jnp.dot(agg.astype(jnp.bfloat16), w1_ref[l],
                    preferred_element_type=jnp.float32) + b1_ref[l:l + 1, :]
        h = jnp.maximum(h, 0.0).astype(jnp.bfloat16)              # ReLU inside GIN MLP
        x_conv = jnp.dot(h, w2_ref[l],
                         preferred_element_type=jnp.float32) + b2_ref[l:l + 1, :]
        emb = x_conv                                              # emb = conv output of last layer
        xr = jnp.maximum(x_conv, 0.0)                             # outer F.relu (f32)
        # TODO(synk): F.dropout is identity in eval mode; stochastic dropout not implemented.
        if l != NUM_LAYERS - 1:                                   # LayerNorm except after last layer
            # Statistics over the 75 real features only (padded lanes are zero before centering).
            mu = jnp.sum(xr, axis=-1, keepdims=True) * (1.0 / HIDDEN)
            xc = xr - mu
            var = jnp.sum((xc * feat_mask) ** 2, axis=-1, keepdims=True) * (1.0 / HIDDEN)
            xr = xc * lax.rsqrt(var + LN_EPS) * lng_ref[l:l + 1, :] + lnb_ref[l:l + 1, :]
            # Padded lanes return to exactly zero because gamma/beta pads are zero.
        x = xr.astype(jnp.bfloat16)                               # bf16 between layers
    emb_ref[...] = emb

    # global_mean_pool: exact 0/1 one-hot in bf16 on the MXU, f32 1/count scale applied after.
    pooled = jnp.dot(pool_ref[...], x, preferred_element_type=jnp.float32) * invc_ref[...]
    # post_mp: Linear(hidden, hidden) -> Linear(hidden, output_dim)  (no nonlinearity between)
    h = jnp.dot(pooled.astype(jnp.bfloat16), wp1_ref[...],
                preferred_element_type=jnp.float32) + bp1_ref[...]
    logits = jnp.dot(h.astype(jnp.bfloat16), wp2_ref[...],
                     preferred_element_type=jnp.float32) + bp2_ref[...]
    # log_softmax over the 4 real classes only (lanes >= OUTPUT_DIM are padding).
    valid = lax.broadcasted_iota(jnp.int32, logits.shape, 1) < OUTPUT_DIM
    masked = jnp.where(valid, logits, jnp.float32(-1e30))
    m = jnp.max(masked, axis=-1, keepdims=True)
    lse = jnp.log(jnp.sum(jnp.exp(masked - m), axis=-1, keepdims=True)) + m
    out_ref[...] = jnp.where(valid, logits - lse, 0.0)


def finetuning_gcn_forward(x, edge_index, batch, num_graphs, params, *, target_rows=256):
    """Returns (emb, log_softmax(post_mp(pooled))) like finetuning_GCN.forward (eval mode)."""
    x_np = np.asarray(x, dtype=np.float32)
    ei = np.asarray(edge_index)
    batch_np = np.asarray(batch)
    n = x_np.shape[0]

    counts = np.bincount(batch_np, minlength=num_graphs)
    max_graph = int(counts.max()) if num_graphs > 0 else 1
    # Per-grid-step node budget: >= largest single graph, aimed at target_rows (fills the MXU M
    # dimension on v6e/v7x), never padding tiny batches beyond their total node count; rounded
    # to 16 rows (bf16 native (16,128) sublane tile).
    npg = _round_up(max(max_graph, min(target_rows, max(n, 1))), 16)

    # Greedy sequential packing of graphs into groups of <= npg nodes.
    groups, cur, cur_nodes = [], [], 0
    for g in range(num_graphs):
        c = int(counts[g])
        if cur and cur_nodes + c > npg:
            groups.append(cur)
            cur, cur_nodes = [], 0
        cur.append(g)
        cur_nodes += c
    if cur:
        groups.append(cur)
    num_groups = len(groups)
    gpg = _round_up(max(len(gr) for gr in groups), 16)

    node_ids = [np.nonzero(batch_np == g)[0] for g in range(num_graphs)]

    slot_of_node = np.zeros((n,), np.int64)
    node_perm = np.full((num_groups * npg,), -1, np.int64)
    graph_slot = np.zeros((num_graphs,), np.int64)
    pool_blocks = np.zeros((num_groups * gpg, npg), np.float32)
    inv_cnt = np.zeros((num_groups * gpg, 1), np.float32)
    for gi, gr in enumerate(groups):
        slot = 0
        for lj, gid in enumerate(gr):
            row = gi * gpg + lj
            graph_slot[gid] = row
            ids = node_ids[gid]
            s = gi * npg + slot
            node_perm[s:s + len(ids)] = ids
            slot_of_node[ids] = np.arange(s, s + len(ids))
            pool_blocks[row, slot:slot + len(ids)] = 1.0
            inv_cnt[row, 0] = 1.0 / max(len(ids), 1)
            slot += len(ids)

    valid = node_perm >= 0
    x_packed = np.zeros((num_groups * npg, DP), np.float32)
    x_packed[np.nonzero(valid)[0], :HIDDEN] = x_np[node_perm[valid]]

    # Per-group dense message-passing blocks (adj + I): built at block granularity on host
    # (no global f32 NxN intermediate, no dense eye; self-loops only on real node rows).
    # Integer edge counts up to 256 are exact in bf16.
    # TODO(synk): at large N switch to an edge-list/CSR aggregation path (scalar-prefetch-driven
    # gather DMAs); this dense per-group path is sized for small/medium batched graphs.
    adj_blocks = np.zeros((num_groups * npg, npg), np.float32)
    src_slots = slot_of_node[ei[0]]
    dst_slots = slot_of_node[ei[1]]
    assert np.all(src_slots // npg == dst_slots // npg), "edge crosses graph groups"
    np.add.at(adj_blocks, (dst_slots, src_slots % npg), 1.0)
    real = np.nonzero(valid)[0]
    adj_blocks[real, real % npg] += 1.0          # GIN self term (eps = 0)

    pad_f = DP - HIDDEN
    xd = jnp.asarray(x_packed, dtype=jnp.bfloat16)
    adjd = jnp.asarray(adj_blocks, dtype=jnp.bfloat16)
    poold = jnp.asarray(pool_blocks, dtype=jnp.bfloat16)
    invd = jnp.asarray(inv_cnt, dtype=jnp.float32)

    # Lane-pad parameters (pads are zero, so the 75-feature math is unchanged).
    w1 = jnp.pad(params["w1"], ((0, 0), (0, pad_f), (0, pad_f))).astype(jnp.bfloat16)
    w2 = jnp.pad(params["w2"], ((0, 0), (0, pad_f), (0, pad_f))).astype(jnp.bfloat16)
    b1 = jnp.pad(params["b1"], ((0, 0), (0, pad_f)))
    b2 = jnp.pad(params["b2"], ((0, 0), (0, pad_f)))
    ln_g = jnp.pad(params["ln_g"], ((0, 0), (0, pad_f)))     # gamma padded with zeros
    ln_b = jnp.pad(params["ln_b"], ((0, 0), (0, pad_f)))
    wp1 = jnp.pad(params["wp1"], ((0, pad_f), (0, pad_f))).astype(jnp.bfloat16)
    bp1 = jnp.pad(params["bp1"], ((0, 0), (0, pad_f)))
    wp2 = jnp.pad(params["wp2"], ((0, pad_f), (0, DP - OUTPUT_DIM))).astype(jnp.bfloat16)
    bp2 = jnp.pad(params["bp2"], ((0, 0), (0, DP - OUTPUT_DIM)))

    # Chip-aware scoped-VMEM budget (v7x has 64 MiB per TC vs 128 MiB on v5e/v6e).
    streamed = 2 * (npg * DP * 2 + npg * npg * 2 + gpg * npg * 2 + gpg * 4)   # double-buffered
    outputs = 2 * (npg * DP * 4 + gpg * DP * 4)
    weights = (2 * NUM_LAYERS * DP * DP * 2 + 2 * DP * DP * 2
               + 2 * NUM_LAYERS * DP * 4 + (NUM_LAYERS - 1) * DP * 4 + 2 * DP * 4)
    per_step = streamed + outputs + weights
    try:
        vmem_cap = int(pltpu.get_tpu_info().vmem_capacity_bytes)
    except Exception:
        vmem_cap = 64 * 1024 * 1024
    vmem_limit = int(min(max(4 * per_step, 32 * 1024 * 1024), int(0.6 * vmem_cap)))

    grid_spec = pltpu.PrefetchScalarGridSpec(
        num_scalar_prefetch=0,
        grid=(num_groups,),
        in_specs=[
            pl.BlockSpec((npg, DP), lambda g: (g, 0)),             # x block
            pl.BlockSpec((npg, npg), lambda g: (g, 0)),            # adj block
            pl.BlockSpec((gpg, npg), lambda g: (g, 0)),            # pool one-hot block
            pl.BlockSpec((gpg, 1), lambda g: (g, 0)),              # 1/count block
            pl.BlockSpec((NUM_LAYERS, DP, DP), lambda g: (0, 0, 0)),
            pl.BlockSpec((NUM_LAYERS, DP), lambda g: (0, 0)),
            pl.BlockSpec((NUM_LAYERS, DP, DP), lambda g: (0, 0, 0)),
            pl.BlockSpec((NUM_LAYERS, DP), lambda g: (0, 0)),
            pl.BlockSpec((NUM_LAYERS - 1, DP), lambda g: (0, 0)),
            pl.BlockSpec((NUM_LAYERS - 1, DP), lambda g: (0, 0)),
            pl.BlockSpec((DP, DP), lambda g: (0, 0)),
            pl.BlockSpec((1, DP), lambda g: (0, 0)),
            pl.BlockSpec((DP, DP), lambda g: (0, 0)),
            pl.BlockSpec((1, DP), lambda g: (0, 0)),
        ],
        out_specs=(
            pl.BlockSpec((npg, DP), lambda g: (g, 0)),             # emb block (lane-dense)
            pl.BlockSpec((gpg, DP), lambda g: (g, 0)),             # log-probs block (lane-dense)
        ),
    )

    emb_packed, logp_packed = pl.pallas_call(
        _gcn_kernel,
        out_shape=(jax.ShapeDtypeStruct((num_groups * npg, DP), jnp.float32),
                   jax.ShapeDtypeStruct((num_groups * gpg, DP), jnp.float32)),
        grid_spec=grid_spec,
        compiler_params=pltpu.CompilerParams(
            dimension_semantics=("parallel",),
            vmem_limit_bytes=vmem_limit),
    )(xd, adjd, poold, invd, w1, b1, w2, b2, ln_g, ln_b, wp1, bp1, wp2, bp2)

    # Un-permute packed outputs back to original node / graph order (padded rows never gathered).
    emb = emb_packed[jnp.asarray(slot_of_node), :HIDDEN]
    logp = logp_packed[jnp.asarray(graph_slot), :OUTPUT_DIM]
    return emb, logp


def init_params(key):
    """Deterministic synthetic parameters (PyTorch Linear-style uniform init), unpadded."""
    keys = jax.random.split(key, 16)

    def lin(k, fan_in, fan_out):
        bound = 1.0 / float(np.sqrt(fan_in))
        kw, kb = jax.random.split(k)
        w = jax.random.uniform(kw, (fan_in, fan_out), jnp.float32, -bound, bound)
        b = jax.random.uniform(kb, (fan_out,), jnp.float32, -bound, bound)
        return w, b

    w1s, b1s, w2s, b2s = [], [], [], []
    for l in range(NUM_LAYERS):
        w, b = lin(keys[2 * l], HIDDEN, HIDDEN)
        w1s.append(w); b1s.append(b)
        w, b = lin(keys[2 * l + 1], HIDDEN, HIDDEN)
        w2s.append(w); b2s.append(b)
    wp1, bp1 = lin(keys[8], HIDDEN, HIDDEN)
    wp2, bp2 = lin(keys[9], HIDDEN, OUTPUT_DIM)
    return dict(
        w1=jnp.stack(w1s), b1=jnp.stack(b1s),
        w2=jnp.stack(w2s), b2=jnp.stack(b2s),
        ln_g=jnp.ones((NUM_LAYERS - 1, HIDDEN), jnp.float32),
        ln_b=jnp.zeros((NUM_LAYERS - 1, HIDDEN), jnp.float32),
        wp1=wp1, bp1=bp1[None, :], wp2=wp2, bp2=bp2[None, :],
    )


def reference_forward(x, edge_index, batch, num_graphs, p):
    """Pure-JAX f32 reference mirroring the PyTorch forward (eval mode)."""
    n = x.shape[0]
    adj = jnp.zeros((n, n), jnp.float32).at[edge_index[1], edge_index[0]].add(1.0)
    onehot = (jnp.arange(num_graphs)[:, None] == batch[None, :]).astype(jnp.float32)
    pool = onehot / jnp.maximum(onehot.sum(axis=1, keepdims=True), 1.0)
    xx = x.astype(jnp.float32)
    emb = xx
    for l in range(NUM_LAYERS):
        agg = xx + adj @ xx
        h = jnp.maximum(agg @ p["w1"][l] + p["b1"][l], 0.0)
        x_conv = h @ p["w2"][l] + p["b2"][l]
        emb = x_conv
        xx = jnp.maximum(x_conv, 0.0)
        if l != NUM_LAYERS - 1:
            mu = xx.mean(-1, keepdims=True)
            var = ((xx - mu) ** 2).mean(-1, keepdims=True)
            xx = (xx - mu) / jnp.sqrt(var + LN_EPS) * p["ln_g"][l] + p["ln_b"][l]
    pooled = pool @ xx
    logits = (pooled @ p["wp1"] + p["bp1"]) @ p["wp2"] + p["bp2"]
    return emb, jax.nn.log_softmax(logits, axis=1)


if __name__ == "__main__":
    key = jax.random.PRNGKey(0)
    kx, kp = jax.random.split(key)

    # Small synthetic batch: 4 graphs with differing sizes (bidirectional ring each), sized so
    # the wrapper packs them into 2 graph-groups -> grid=(2,) exercises the parallel grid and
    # the per-group BlockSpec streaming path.
    graph_sizes = [12, 9, 16, 11]
    num_graphs = len(graph_sizes)
    src_list, dst_list, batch_list = [], [], []
    base = 0
    for g, sz in enumerate(graph_sizes):
        for i in range(sz):
            s, t = base + i, base + (i + 1) % sz
            src_list += [s, t]
            dst_list += [t, s]
        batch_list += [g] * sz
        base += sz
    n = base
    edge_index = jnp.array([src_list, dst_list], dtype=jnp.int32)
    batch = jnp.array(batch_list, dtype=jnp.int32)
    x = jax.random.normal(kx, (n, HIDDEN), jnp.float32)

    params = init_params(kp)

    emb, logp = finetuning_gcn_forward(x, edge_index, batch, num_graphs, params,
                                       target_rows=32)
    emb, logp = jax.block_until_ready(emb), jax.block_until_ready(logp)

    emb_ref, logp_ref = reference_forward(x, edge_index, batch, num_graphs, params)
    # Tolerance reflects bf16 MXU operands / bf16 inter-layer activations (f32 accumulation)
    # vs. a pure-f32 reference.
    np.testing.assert_allclose(np.asarray(emb), np.asarray(emb_ref), rtol=3e-2, atol=3e-2)
    np.testing.assert_allclose(np.asarray(logp), np.asarray(logp_ref), rtol=3e-2, atol=3e-2)
    assert emb.shape == (n, HIDDEN) and logp.shape == (num_graphs, OUTPUT_DIM)

    print("KERNEL_OK")
</pallas_src>

<mosaic_0001>
module attributes {stable_mosaic.version = 11 : i64} {
  func.func @_gcn_kernel(%arg0: i32, %arg1: memref<32x128xbf16, #tpu.memory_space<vmem>>, %arg2: memref<32x32xbf16, #tpu.memory_space<vmem>>, %arg3: memref<16x32xbf16, #tpu.memory_space<vmem>>, %arg4: memref<16x1xf32, #tpu.memory_space<vmem>>, %arg5: memref<4x128x128xbf16, #tpu.memory_space<vmem>>, %arg6: memref<4x128xf32, #tpu.memory_space<vmem>>, %arg7: memref<4x128x128xbf16, #tpu.memory_space<vmem>>, %arg8: memref<4x128xf32, #tpu.memory_space<vmem>>, %arg9: memref<3x128xf32, #tpu.memory_space<vmem>>, %arg10: memref<3x128xf32, #tpu.memory_space<vmem>>, %arg11: memref<128x128xbf16, #tpu.memory_space<vmem>>, %arg12: memref<1x128xf32, #tpu.memory_space<vmem>>, %arg13: memref<128x128xbf16, #tpu.memory_space<vmem>>, %arg14: memref<1x128xf32, #tpu.memory_space<vmem>>, %arg15: memref<32x128xf32, #tpu.memory_space<vmem>>, %arg16: memref<16x128xf32, #tpu.memory_space<vmem>>) attributes {dimension_semantics = [#tpu.dimension_semantics<parallel>], iteration_bounds = array<i64: 2>, scalar_prefetch = 0 : i64, scratch_operands = 0 : i64, tpu.core_type = #tpu.core_type<tc>, window_params = [{transform_indices = @transform_0, window_bounds = array<i64: 32, 128>}, {transform_indices = @transform_1, window_bounds = array<i64: 32, 32>}, {transform_indices = @transform_2, window_bounds = array<i64: 16, 32>}, {transform_indices = @transform_3, window_bounds = array<i64: 16, 1>}, {pipeline_mode = #tpu.pipeline_mode<synchronous>, transform_indices = @transform_4, window_bounds = array<i64: 4, 128, 128>}, {pipeline_mode = #tpu.pipeline_mode<synchronous>, transform_indices = @transform_5, window_bounds = array<i64: 4, 128>}, {pipeline_mode = #tpu.pipeline_mode<synchronous>, transform_indices = @transform_6, window_bounds = array<i64: 4, 128, 128>}, {pipeline_mode = #tpu.pipeline_mode<synchronous>, transform_indices = @transform_7, window_bounds = array<i64: 4, 128>}, {pipeline_mode = #tpu.pipeline_mode<synchronous>, transform_indices = @transform_8, window_bounds = array<i64: 3, 128>}, {pipeline_mode = #tpu.pipeline_mode<synchronous>, transform_indices = @transform_9, window_bounds = array<i64: 3, 128>}, {pipeline_mode = #tpu.pipeline_mode<synchronous>, transform_indices = @transform_10, window_bounds = array<i64: 128, 128>}, {pipeline_mode = #tpu.pipeline_mode<synchronous>, transform_indices = @transform_11, window_bounds = array<i64: 1, 128>}, {pipeline_mode = #tpu.pipeline_mode<synchronous>, transform_indices = @transform_12, window_bounds = array<i64: 128, 128>}, {pipeline_mode = #tpu.pipeline_mode<synchronous>, transform_indices = @transform_13, window_bounds = array<i64: 1, 128>}, {transform_indices = @transform_14, window_bounds = array<i64: 32, 128>}, {transform_indices = @transform_15, window_bounds = array<i64: 16, 128>}]} {
    %c0 = arith.constant 0 : index
    %c0_0 = arith.constant 0 : index
    %0 = vector.load %arg1[%c0, %c0_0] : memref<32x128xbf16, #tpu.memory_space<vmem>>, vector<32x128xbf16>
    %c0_1 = arith.constant 0 : index
    %c0_2 = arith.constant 0 : index
    %1 = vector.load %arg2[%c0_1, %c0_2] : memref<32x32xbf16, #tpu.memory_space<vmem>>, vector<32x32xbf16>
    %2 = tpu.iota {dimensions = array<i32: 1>} : vector<1x128xi32>
    %c75_i32 = arith.constant 75 : i32
    %3 = vector.broadcast %c75_i32 : i32 to vector<1x128xi32>
    %4 = arith.cmpi slt, %2, %3 : vector<1x128xi32>
    %5 = arith.extui %4 : vector<1x128xi1> to vector<1x128xi32>
    %6 = arith.sitofp %5 : vector<1x128xi32> to vector<1x128xf32>
    %cst = arith.constant dense<0.000000e+00> : vector<32x128xf32>
    %7 = tpu.matmul %1, %0, %cst {dimension_numbers = #tpu.dot_dimension_numbers<[1], [0], [0], [1], [0, 0, 1, 1], [], []>} : vector<32x32xbf16>, vector<32x128xbf16>, vector<32x128xf32> -> vector<32x128xf32>
    %8 = arith.truncf %7 : vector<32x128xf32> to vector<32x128xbf16>
    %c0_3 = arith.constant 0 : index
    %c0_4 = arith.constant 0 : index
    %c0_5 = arith.constant 0 : index
    %9 = vector.load %arg5[%c0_3, %c0_4, %c0_5] : memref<4x128x128xbf16, #tpu.memory_space<vmem>>, vector<1x128x128xbf16>
    %10 = vector.shape_cast %9 : vector<1x128x128xbf16> to vector<128x128xbf16>
    %cst_6 = arith.constant dense<0.000000e+00> : vector<32x128xf32>
    %11 = tpu.matmul %8, %10, %cst_6 {dimension_numbers = #tpu.dot_dimension_numbers<[1], [0], [0], [1], [0, 0, 1, 1], [], []>} : vector<32x128xbf16>, vector<128x128xbf16>, vector<32x128xf32> -> vector<32x128xf32>
    %c0_7 = arith.constant 0 : index
    %c0_8 = arith.constant 0 : index
    %12 = vector.load %arg6[%c0_7, %c0_8] : memref<4x128xf32, #tpu.memory_space<vmem>>, vector<1x128xf32>
    %13 = vector.broadcast %12 : vector<1x128xf32> to vector<32x128xf32>
    %14 = arith.addf %11, %13 : vector<32x128xf32>
    %cst_9 = arith.constant 0.000000e+00 : f32
    %15 = vector.broadcast %cst_9 : f32 to vector<32x128xf32>
    %16 = arith.maximumf %14, %15 : vector<32x128xf32>
    %17 = arith.truncf %16 : vector<32x128xf32> to vector<32x128xbf16>
    %c0_10 = arith.constant 0 : index
    %c0_11 = arith.constant 0 : index
    %c0_12 = arith.constant 0 : index
    %18 = vector.load %arg7[%c0_10, %c0_11, %c0_12] : memref<4x128x128xbf16, #tpu.memory_space<vmem>>, vector<1x128x128xbf16>
    %19 = vector.shape_cast %18 : vector<1x128x128xbf16> to vector<128x128xbf16>
    %cst_13 = arith.constant dense<0.000000e+00> : vector<32x128xf32>
    %20 = tpu.matmul %17, %19, %cst_13 {dimension_numbers = #tpu.dot_dimension_numbers<[1], [0], [0], [1], [0, 0, 1, 1], [], []>} : vector<32x128xbf16>, vector<128x128xbf16>, vector<32x128xf32> -> vector<32x128xf32>
    %c0_14 = arith.constant 0 : index
    %c0_15 = arith.constant 0 : index
    %21 = vector.load %arg8[%c0_14, %c0_15] : memref<4x128xf32, #tpu.memory_space<vmem>>, vector<1x128xf32>
    %22 = vector.broadcast %21 : vector<1x128xf32> to vector<32x128xf32>
    %23 = arith.addf %20, %22 : vector<32x128xf32>
    %cst_16 = arith.constant 0.000000e+00 : f32
    %24 = vector.broadcast %cst_16 : f32 to vector<32x128xf32>
    %25 = arith.maximumf %23, %24 : vector<32x128xf32>
    %cst_17 = arith.constant dense<0.000000e+00> : vector<32xf32>
    %26 = vector.multi_reduction <add>, %25, %cst_17 [1] : vector<32x128xf32> to vector<32xf32>
    %27 = vector.shape_cast %26 : vector<32xf32> to vector<32x1xf32>
    %cst_18 = arith.constant 0.0133333337 : f32
    %28 = vector.broadcast %cst_18 : f32 to vector<32x1xf32>
    %29 = arith.mulf %27, %28 : vector<32x1xf32>
    %30 = vector.broadcast %29 : vector<32x1xf32> to vector<32x128xf32>
    %31 = arith.subf %25, %30 : vector<32x128xf32>
    %32 = vector.broadcast %6 : vector<1x128xf32> to vector<32x128xf32>
    %33 = arith.mulf %31, %32 : vector<32x128xf32>
    %34 = arith.mulf %33, %33 : vector<32x128xf32>
    %cst_19 = arith.constant dense<0.000000e+00> : vector<32xf32>
    %35 = vector.multi_reduction <add>, %34, %cst_19 [1] : vector<32x128xf32> to vector<32xf32>
    %36 = vector.shape_cast %35 : vector<32xf32> to vector<32x1xf32>
    %cst_20 = arith.constant 0.0133333337 : f32
    %37 = vector.broadcast %cst_20 : f32 to vector<32x1xf32>
    %38 = arith.mulf %36, %37 : vector<32x1xf32>
    %cst_21 = arith.constant 9.99999974E-6 : f32
    %39 = vector.broadcast %cst_21 : f32 to vector<32x1xf32>
    %40 = arith.addf %38, %39 : vector<32x1xf32>
    %41 = math.rsqrt %40 : vector<32x1xf32>
    %42 = vector.broadcast %41 : vector<32x1xf32> to vector<32x128xf32>
    %43 = arith.mulf %31, %42 : vector<32x128xf32>
    %c0_22 = arith.constant 0 : index
    %c0_23 = arith.constant 0 : index
    %44 = vector.load %arg9[%c0_22, %c0_23] : memref<3x128xf32, #tpu.memory_space<vmem>>, vector<1x128xf32>
    %45 = vector.broadcast %44 : vector<1x128xf32> to vector<32x128xf32>
    %46 = arith.mulf %43, %45 : vector<32x128xf32>
    %c0_24 = arith.constant 0 : index
    %c0_25 = arith.constant 0 : index
    %47 = vector.load %arg10[%c0_24, %c0_25] : memref<3x128xf32, #tpu.memory_space<vmem>>, vector<1x128xf32>
    %48 = vector.broadcast %47 : vector<1x128xf32> to vector<32x128xf32>
    %49 = arith.addf %46, %48 : vector<32x128xf32>
    %50 = arith.truncf %49 : vector<32x128xf32> to vector<32x128xbf16>
    %cst_26 = arith.constant dense<0.000000e+00> : vector<32x128xf32>
    %51 = tpu.matmul %1, %50, %cst_26 {dimension_numbers = #tpu.dot_dimension_numbers<[1], [0], [0], [1], [0, 0, 1, 1], [], []>} : vector<32x32xbf16>, vector<32x128xbf16>, vector<32x128xf32> -> vector<32x128xf32>
    %52 = arith.truncf %51 : vector<32x128xf32> to vector<32x128xbf16>
    %c1 = arith.constant 1 : index
    %c0_27 = arith.constant 0 : index
    %c0_28 = arith.constant 0 : index
    %53 = vector.load %arg5[%c1, %c0_27, %c0_28] : memref<4x128x128xbf16, #tpu.memory_space<vmem>>, vector<1x128x128xbf16>
    %54 = vector.shape_cast %53 : vector<1x128x128xbf16> to vector<128x128xbf16>
    %cst_29 = arith.constant dense<0.000000e+00> : vector<32x128xf32>
    %55 = tpu.matmul %52, %54, %cst_29 {dimension_numbers = #tpu.dot_dimension_numbers<[1], [0], [0], [1], [0, 0, 1, 1], [], []>} : vector<32x128xbf16>, vector<128x128xbf16>, vector<32x128xf32> -> vector<32x128xf32>
    %c1_30 = arith.constant 1 : index
    %c0_31 = arith.constant 0 : index
    %56 = vector.load %arg6[%c1_30, %c0_31] : memref<4x128xf32, #tpu.memory_space<vmem>>, vector<1x128xf32>
    %57 = vector.broadcast %56 : vector<1x128xf32> to vector<32x128xf32>
    %58 = arith.addf %55, %57 : vector<32x128xf32>
    %cst_32 = arith.constant 0.000000e+00 : f32
    %59 = vector.broadcast %cst_32 : f32 to vector<32x128xf32>
    %60 = arith.maximumf %58, %59 : vector<32x128xf32>
    %61 = arith.truncf %60 : vector<32x128xf32> to vector<32x128xbf16>
    %c1_33 = arith.constant 1 : index
    %c0_34 = arith.constant 0 : index
    %c0_35 = arith.constant 0 : index
    %62 = vector.load %arg7[%c1_33, %c0_34, %c0_35] : memref<4x128x128xbf16, #tpu.memory_space<vmem>>, vector<1x128x128xbf16>
    %63 = vector.shape_cast %62 : vector<1x128x128xbf16> to vector<128x128xbf16>
    %cst_36 = arith.constant dense<0.000000e+00> : vector<32x128xf32>
    %64 = tpu.matmul %61, %63, %cst_36 {dimension_numbers = #tpu.dot_dimension_numbers<[1], [0], [0], [1], [0, 0, 1, 1], [], []>} : vector<32x128xbf16>, vector<128x128xbf16>, vector<32x128xf32> -> vector<32x128xf32>
    %c1_37 = arith.constant 1 : index
    %c0_38 = arith.constant 0 : index
    %65 = vector.load %arg8[%c1_37, %c0_38] : memref<4x128xf32, #tpu.memory_space<vmem>>, vector<1x128xf32>
    %66 = vector.broadcast %65 : vector<1x128xf32> to vector<32x128xf32>
    %67 = arith.addf %64, %66 : vector<32x128xf32>
    %cst_39 = arith.constant 0.000000e+00 : f32
    %68 = vector.broadcast %cst_39 : f32 to vector<32x128xf32>
    %69 = arith.maximumf %67, %68 : vector<32x128xf32>
    %cst_40 = arith.constant dense<0.000000e+00> : vector<32xf32>
    %70 = vector.multi_reduction <add>, %69, %cst_40 [1] : vector<32x128xf32> to vector<32xf32>
    %71 = vector.shape_cast %70 : vector<32xf32> to vector<32x1xf32>
    %cst_41 = arith.constant 0.0133333337 : f32
    %72 = vector.broadcast %cst_41 : f32 to vector<32x1xf32>
    %73 = arith.mulf %71, %72 : vector<32x1xf32>
    %74 = vector.broadcast %73 : vector<32x1xf32> to vector<32x128xf32>
    %75 = arith.subf %69, %74 : vector<32x128xf32>
    %76 = vector.broadcast %6 : vector<1x128xf32> to vector<32x128xf32>
    %77 = arith.mulf %75, %76 : vector<32x128xf32>
    %78 = arith.mulf %77, %77 : vector<32x128xf32>
    %cst_42 = arith.constant dense<0.000000e+00> : vector<32xf32>
    %79 = vector.multi_reduction <add>, %78, %cst_42 [1] : vector<32x128xf32> to vector<32xf32>
    %80 = vector.shape_cast %79 : vector<32xf32> to vector<32x1xf32>
    %cst_43 = arith.constant 0.0133333337 : f32
    %81 = vector.broadcast %cst_43 : f32 to vector<32x1xf32>
    %82 = arith.mulf %80, %81 : vector<32x1xf32>
    %cst_44 = arith.constant 9.99999974E-6 : f32
    %83 = vector.broadcast %cst_44 : f32 to vector<32x1xf32>
    %84 = arith.addf %82, %83 : vector<32x1xf32>
    %85 = math.rsqrt %84 : vector<32x1xf32>
    %86 = vector.broadcast %85 : vector<32x1xf32> to vector<32x128xf32>
    %87 = arith.mulf %75, %86 : vector<32x128xf32>
    %c1_45 = arith.constant 1 : index
    %c0_46 = arith.constant 0 : index
    %88 = vector.load %arg9[%c1_45, %c0_46] : memref<3x128xf32, #tpu.memory_space<vmem>>, vector<1x128xf32>
    %89 = vector.broadcast %88 : vector<1x128xf32> to vector<32x128xf32>
    %90 = arith.mulf %87, %89 : vector<32x128xf32>
    %c1_47 = arith.constant 1 : index
    %c0_48 = arith.constant 0 : index
    %91 = vector.load %arg10[%c1_47, %c0_48] : memref<3x128xf32, #tpu.memory_space<vmem>>, vector<1x128xf32>
    %92 = vector.broadcast %91 : vector<1x128xf32> to vector<32x128xf32>
    %93 = arith.addf %90, %92 : vector<32x128xf32>
    %94 = arith.truncf %93 : vector<32x128xf32> to vector<32x128xbf16>
    %cst_49 = arith.constant dense<0.000000e+00> : vector<32x128xf32>
    %95 = tpu.matmul %1, %94, %cst_49 {dimension_numbers = #tpu.dot_dimension_numbers<[1], [0], [0], [1], [0, 0, 1, 1], [], []>} : vector<32x32xbf16>, vector<32x128xbf16>, vector<32x128xf32> -> vector<32x128xf32>
    %96 = arith.truncf %95 : vector<32x128xf32> to vector<32x128xbf16>
    %c2 = arith.constant 2 : index
    %c0_50 = arith.constant 0 : index
    %c0_51 = arith.constant 0 : index
    %97 = vector.load %arg5[%c2, %c0_50, %c0_51] : memref<4x128x128xbf16, #tpu.memory_space<vmem>>, vector<1x128x128xbf16>
    %98 = vector.shape_cast %97 : vector<1x128x128xbf16> to vector<128x128xbf16>
    %cst_52 = arith.constant dense<0.000000e+00> : vector<32x128xf32>
    %99 = tpu.matmul %96, %98, %cst_52 {dimension_numbers = #tpu.dot_dimension_numbers<[1], [0], [0], [1], [0, 0, 1, 1], [], []>} : vector<32x128xbf16>, vector<128x128xbf16>, vector<32x128xf32> -> vector<32x128xf32>
    %c2_53 = arith.constant 2 : index
    %c0_54 = arith.constant 0 : index
    %100 = vector.load %arg6[%c2_53, %c0_54] : memref<4x128xf32, #tpu.memory_space<vmem>>, vector<1x128xf32>
    %101 = vector.broadcast %100 : vector<1x128xf32> to vector<32x128xf32>
    %102 = arith.addf %99, %101 : vector<32x128xf32>
    %cst_55 = arith.constant 0.000000e+00 : f32
    %103 = vector.broadcast %cst_55 : f32 to vector<32x128xf32>
    %104 = arith.maximumf %102, %103 : vector<32x128xf32>
    %105 = arith.truncf %104 : vector<32x128xf32> to vector<32x128xbf16>
    %c2_56 = arith.constant 2 : index
    %c0_57 = arith.constant 0 : index
    %c0_58 = arith.constant 0 : index
    %106 = vector.load %arg7[%c2_56, %c0_57, %c0_58] : memref<4x128x128xbf16, #tpu.memory_space<vmem>>, vector<1x128x128xbf16>
    %107 = vector.shape_cast %106 : vector<1x128x128xbf16> to vector<128x128xbf16>
    %cst_59 = arith.constant dense<0.000000e+00> : vector<32x128xf32>
    %108 = tpu.matmul %105, %107, %cst_59 {dimension_numbers = #tpu.dot_dimension_numbers<[1], [0], [0], [1], [0, 0, 1, 1], [], []>} : vector<32x128xbf16>, vector<128x128xbf16>, vector<32x128xf32> -> vector<32x128xf32>
    %c2_60 = arith.constant 2 : index
    %c0_61 = arith.constant 0 : index
    %109 = vector.load %arg8[%c2_60, %c0_61] : memref<4x128xf32, #tpu.memory_space<vmem>>, vector<1x128xf32>
    %110 = vector.broadcast %109 : vector<1x128xf32> to vector<32x128xf32>
    %111 = arith.addf %108, %110 : vector<32x128xf32>
    %cst_62 = arith.constant 0.000000e+00 : f32
    %112 = vector.broadcast %cst_62 : f32 to vector<32x128xf32>
    %113 = arith.maximumf %111, %112 : vector<32x128xf32>
    %cst_63 = arith.constant dense<0.000000e+00> : vector<32xf32>
    %114 = vector.multi_reduction <add>, %113, %cst_63 [1] : vector<32x128xf32> to vector<32xf32>
    %115 = vector.shape_cast %114 : vector<32xf32> to vector<32x1xf32>
    %cst_64 = arith.constant 0.0133333337 : f32
    %116 = vector.broadcast %cst_64 : f32 to vector<32x1xf32>
    %117 = arith.mulf %115, %116 : vector<32x1xf32>
    %118 = vector.broadcast %117 : vector<32x1xf32> to vector<32x128xf32>
    %119 = arith.subf %113, %118 : vector<32x128xf32>
    %120 = vector.broadcast %6 : vector<1x128xf32> to vector<32x128xf32>
    %121 = arith.mulf %119, %120 : vector<32x128xf32>
    %122 = arith.mulf %121, %121 : vector<32x128xf32>
    %cst_65 = arith.constant dense<0.000000e+00> : vector<32xf32>
    %123 = vector.multi_reduction <add>, %122, %cst_65 [1] : vector<32x128xf32> to vector<32xf32>
    %124 = vector.shape_cast %123 : vector<32xf32> to vector<32x1xf32>
    %cst_66 = arith.constant 0.0133333337 : f32
    %125 = vector.broadcast %cst_66 : f32 to vector<32x1xf32>
    %126 = arith.mulf %124, %125 : vector<32x1xf32>
    %cst_67 = arith.constant 9.99999974E-6 : f32
    %127 = vector.broadcast %cst_67 : f32 to vector<32x1xf32>
    %128 = arith.addf %126, %127 : vector<32x1xf32>
    %129 = math.rsqrt %128 : vector<32x1xf32>
    %130 = vector.broadcast %129 : vector<32x1xf32> to vector<32x128xf32>
    %131 = arith.mulf %119, %130 : vector<32x128xf32>
    %c2_68 = arith.constant 2 : index
    %c0_69 = arith.constant 0 : index
    %132 = vector.load %arg9[%c2_68, %c0_69] : memref<3x128xf32, #tpu.memory_space<vmem>>, vector<1x128xf32>
    %133 = vector.broadcast %132 : vector<1x128xf32> to vector<32x128xf32>
    %134 = arith.mulf %131, %133 : vector<32x128xf32>
    %c2_70 = arith.constant 2 : index
    %c0_71 = arith.constant 0 : index
    %135 = vector.load %arg10[%c2_70, %c0_71] : memref<3x128xf32, #tpu.memory_space<vmem>>, vector<1x128xf32>
    %136 = vector.broadcast %135 : vector<1x128xf32> to vector<32x128xf32>
    %137 = arith.addf %134, %136 : vector<32x128xf32>
    %138 = arith.truncf %137 : vector<32x128xf32> to vector<32x128xbf16>
    %cst_72 = arith.constant dense<0.000000e+00> : vector<32x128xf32>
    %139 = tpu.matmul %1, %138, %cst_72 {dimension_numbers = #tpu.dot_dimension_numbers<[1], [0], [0], [1], [0, 0, 1, 1], [], []>} : vector<32x32xbf16>, vector<32x128xbf16>, vector<32x128xf32> -> vector<32x128xf32>
    %140 = arith.truncf %139 : vector<32x128xf32> to vector<32x128xbf16>
    %c3 = arith.constant 3 : index
    %c0_73 = arith.constant 0 : index
    %c0_74 = arith.constant 0 : index
    %141 = vector.load %arg5[%c3, %c0_73, %c0_74] : memref<4x128x128xbf16, #tpu.memory_space<vmem>>, vector<1x128x128xbf16>
    %142 = vector.shape_cast %141 : vector<1x128x128xbf16> to vector<128x128xbf16>
    %cst_75 = arith.constant dense<0.000000e+00> : vector<32x128xf32>
    %143 = tpu.matmul %140, %142, %cst_75 {dimension_numbers = #tpu.dot_dimension_numbers<[1], [0], [0], [1], [0, 0, 1, 1], [], []>} : vector<32x128xbf16>, vector<128x128xbf16>, vector<32x128xf32> -> vector<32x128xf32>
    %c3_76 = arith.constant 3 : index
    %c0_77 = arith.constant 0 : index
    %144 = vector.load %arg6[%c3_76, %c0_77] : memref<4x128xf32, #tpu.memory_space<vmem>>, vector<1x128xf32>
    %145 = vector.broadcast %144 : vector<1x128xf32> to vector<32x128xf32>
    %146 = arith.addf %143, %145 : vector<32x128xf32>
    %cst_78 = arith.constant 0.000000e+00 : f32
    %147 = vector.broadcast %cst_78 : f32 to vector<32x128xf32>
    %148 = arith.maximumf %146, %147 : vector<32x128xf32>
    %149 = arith.truncf %148 : vector<32x128xf32> to vector<32x128xbf16>
    %c3_79 = arith.constant 3 : index
    %c0_80 = arith.constant 0 : index
    %c0_81 = arith.constant 0 : index
    %150 = vector.load %arg7[%c3_79, %c0_80, %c0_81] : memref<4x128x128xbf16, #tpu.memory_space<vmem>>, vector<1x128x128xbf16>
    %151 = vector.shape_cast %150 : vector<1x128x128xbf16> to vector<128x128xbf16>
    %cst_82 = arith.constant dense<0.000000e+00> : vector<32x128xf32>
    %152 = tpu.matmul %149, %151, %cst_82 {dimension_numbers = #tpu.dot_dimension_numbers<[1], [0], [0], [1], [0, 0, 1, 1], [], []>} : vector<32x128xbf16>, vector<128x128xbf16>, vector<32x128xf32> -> vector<32x128xf32>
    %c3_83 = arith.constant 3 : index
    %c0_84 = arith.constant 0 : index
    %153 = vector.load %arg8[%c3_83, %c0_84] : memref<4x128xf32, #tpu.memory_space<vmem>>, vector<1x128xf32>
    %154 = vector.broadcast %153 : vector<1x128xf32> to vector<32x128xf32>
    %155 = arith.addf %152, %154 : vector<32x128xf32>
    %cst_85 = arith.constant 0.000000e+00 : f32
    %156 = vector.broadcast %cst_85 : f32 to vector<32x128xf32>
    %157 = arith.maximumf %155, %156 : vector<32x128xf32>
    %158 = arith.truncf %157 : vector<32x128xf32> to vector<32x128xbf16>
    %c0_86 = arith.constant 0 : index
    %c0_87 = arith.constant 0 : index
    %159 = vector.load %arg15[%c0_86, %c0_87] : memref<32x128xf32, #tpu.memory_space<vmem>>, vector<32x128xf32>
    tpu.vector_store %arg15[%c0_86, %c0_87], %155 {strides = array<i32>} : memref<32x128xf32, #tpu.memory_space<vmem>>, vector<32x128xf32>,
    %c0_88 = arith.constant 0 : index
    %c0_89 = arith.constant 0 : index
    %160 = vector.load %arg3[%c0_88, %c0_89] : memref<16x32xbf16, #tpu.memory_space<vmem>>, vector<16x32xbf16>
    %cst_90 = arith.constant dense<0.000000e+00> : vector<16x128xf32>
    %161 = tpu.matmul %160, %158, %cst_90 {dimension_numbers = #tpu.dot_dimension_numbers<[1], [0], [0], [1], [0, 0, 1, 1], [], []>} : vector<16x32xbf16>, vector<32x128xbf16>, vector<16x128xf32> -> vector<16x128xf32>
    %c0_91 = arith.constant 0 : index
    %c0_92 = arith.constant 0 : index
    %162 = vector.load %arg4[%c0_91, %c0_92] : memref<16x1xf32, #tpu.memory_space<vmem>>, vector<16x1xf32>
    %163 = vector.broadcast %162 : vector<16x1xf32> to vector<16x128xf32>
    %164 = arith.mulf %161, %163 : vector<16x128xf32>
    %165 = arith.truncf %164 : vector<16x128xf32> to vector<16x128xbf16>
    %c0_93 = arith.constant 0 : index
    %c0_94 = arith.constant 0 : index
    %166 = vector.load %arg11[%c0_93, %c0_94] : memref<128x128xbf16, #tpu.memory_space<vmem>>, vector<128x128xbf16>
    %cst_95 = arith.constant dense<0.000000e+00> : vector<16x128xf32>
    %167 = tpu.matmul %165, %166, %cst_95 {dimension_numbers = #tpu.dot_dimension_numbers<[1], [0], [0], [1], [0, 0, 1, 1], [], []>} : vector<16x128xbf16>, vector<128x128xbf16>, vector<16x128xf32> -> vector<16x128xf32>
    %c0_96 = arith.constant 0 : index
    %c0_97 = arith.constant 0 : index
    %168 = vector.load %arg12[%c0_96, %c0_97] : memref<1x128xf32, #tpu.memory_space<vmem>>, vector<1x128xf32>
    %169 = vector.broadcast %168 : vector<1x128xf32> to vector<16x128xf32>
    %170 = arith.addf %167, %169 : vector<16x128xf32>
    %171 = arith.truncf %170 : vector<16x128xf32> to vector<16x128xbf16>
    %c0_98 = arith.constant 0 : index
    %c0_99 = arith.constant 0 : index
    %172 = vector.load %arg13[%c0_98, %c0_99] : memref<128x128xbf16, #tpu.memory_space<vmem>>, vector<128x128xbf16>
    %cst_100 = arith.constant dense<0.000000e+00> : vector<16x128xf32>
    %173 = tpu.matmul %171, %172, %cst_100 {dimension_numbers = #tpu.dot_dimension_numbers<[1], [0], [0], [1], [0, 0, 1, 1], [], []>} : vector<16x128xbf16>, vector<128x128xbf16>, vector<16x128xf32> -> vector<16x128xf32>
    %c0_101 = arith.constant 0 : index
    %c0_102 = arith.constant 0 : index
    %174 = vector.load %arg14[%c0_101, %c0_102] : memref<1x128xf32, #tpu.memory_space<vmem>>, vector<1x128xf32>
    %175 = vector.broadcast %174 : vector<1x128xf32> to vector<16x128xf32>
    %176 = arith.addf %173, %175 : vector<16x128xf32>
    %177 = tpu.iota {dimensions = array<i32: 1>} : vector<16x128xi32>
    %c4_i32 = arith.constant 4 : i32
    %178 = vector.broadcast %c4_i32 : i32 to vector<16x128xi32>
    %179 = arith.cmpi slt, %177, %178 : vector<16x128xi32>
    %cst_103 = arith.constant -1.000000e+30 : f32
    %180 = vector.broadcast %cst_103 : f32 to vector<16x128xf32>
    %181 = arith.select %179, %176, %180 : vector<16x128xi1>, vector<16x128xf32>
    %cst_104 = arith.constant dense<0xFF800000> : vector<16xf32>
    %182 = vector.multi_reduction <maximumf>, %181, %cst_104 [1] : vector<16x128xf32> to vector<16xf32>
    %183 = vector.shape_cast %182 : vector<16xf32> to vector<16x1xf32>
    %184 = vector.broadcast %183 : vector<16x1xf32> to vector<16x128xf32>
    %185 = arith.subf %181, %184 : vector<16x128xf32>
    %186 = math.exp %185 : vector<16x128xf32>
    %cst_105 = arith.constant dense<0.000000e+00> : vector<16xf32>
    %187 = vector.multi_reduction <add>, %186, %cst_105 [1] : vector<16x128xf32> to vector<16xf32>
    %188 = vector.shape_cast %187 : vector<16xf32> to vector<16x1xf32>
    %189 = math.log %188 : vector<16x1xf32>
    %190 = arith.addf %189, %183 : vector<16x1xf32>
    %191 = vector.broadcast %190 : vector<16x1xf32> to vector<16x128xf32>
    %192 = arith.subf %176, %191 : vector<16x128xf32>
    %cst_106 = arith.constant 0.000000e+00 : f32
    %193 = vector.broadcast %cst_106 : f32 to vector<16x128xf32>
    %194 = arith.select %179, %192, %193 : vector<16x128xi1>, vector<16x128xf32>
    %c0_107 = arith.constant 0 : index
    %c0_108 = arith.constant 0 : index
    %195 = vector.load %arg16[%c0_107, %c0_108] : memref<16x128xf32, #tpu.memory_space<vmem>>, vector<16x128xf32>
    tpu.vector_store %arg16[%c0_107, %c0_108], %194 {strides = array<i32>} : memref<16x128xf32, #tpu.memory_space<vmem>>, vector<16x128xf32>,
    return
  }
  func.func @transform_0(%arg0: i32) -> (i32, i32) {
    %c0_i32 = arith.constant 0 : i32
    %c0_i32_0 = arith.constant 0 : i32
    return %arg0, %c0_i32 : i32, i32
  }
  func.func @transform_1(%arg0: i32) -> (i32, i32) {
    %c0_i32 = arith.constant 0 : i32
    %c0_i32_0 = arith.constant 0 : i32
    return %arg0, %c0_i32 : i32, i32
  }
  func.func @transform_2(%arg0: i32) -> (i32, i32) {
    %c0_i32 = arith.constant 0 : i32
    %c0_i32_0 = arith.constant 0 : i32
    return %arg0, %c0_i32 : i32, i32
  }
  func.func @transform_3(%arg0: i32) -> (i32, i32) {
    %c0_i32 = arith.constant 0 : i32
    %c0_i32_0 = arith.constant 0 : i32
    return %arg0, %c0_i32 : i32, i32
  }
  func.func @transform_4(%arg0: i32) -> (i32, i32, i32) {
    %c0_i32 = arith.constant 0 : i32
    %c0_i32_0 = arith.constant 0 : i32
    %c0_i32_1 = arith.constant 0 : i32
    %c0_i32_2 = arith.constant 0 : i32
    return %c0_i32, %c0_i32_0, %c0_i32_1 : i32, i32, i32
  }
  func.func @transform_5(%arg0: i32) -> (i32, i32) {
    %c0_i32 = arith.constant 0 : i32
    %c0_i32_0 = arith.constant 0 : i32
    %c0_i32_1 = arith.constant 0 : i32
    return %c0_i32, %c0_i32_0 : i32, i32
  }
  func.func @transform_6(%arg0: i32) -> (i32, i32, i32) {
    %c0_i32 = arith.constant 0 : i32
    %c0_i32_0 = arith.constant 0 : i32
    %c0_i32_1 = arith.constant 0 : i32
    %c0_i32_2 = arith.constant 0 : i32
    return %c0_i32, %c0_i32_0, %c0_i32_1 : i32, i32, i32
  }
  func.func @transform_7(%arg0: i32) -> (i32, i32) {
    %c0_i32 = arith.constant 0 : i32
    %c0_i32_0 = arith.constant 0 : i32
    %c0_i32_1 = arith.constant 0 : i32
    return %c0_i32, %c0_i32_0 : i32, i32
  }
  func.func @transform_8(%arg0: i32) -> (i32, i32) {
    %c0_i32 = arith.constant 0 : i32
    %c0_i32_0 = arith.constant 0 : i32
    %c0_i32_1 = arith.constant 0 : i32
    return %c0_i32, %c0_i32_0 : i32, i32
  }
  func.func @transform_9(%arg0: i32) -> (i32, i32) {
    %c0_i32 = arith.constant 0 : i32
    %c0_i32_0 = arith.constant 0 : i32
    %c0_i32_1 = arith.constant 0 : i32
    return %c0_i32, %c0_i32_0 : i32, i32
  }
  func.func @transform_10(%arg0: i32) -> (i32, i32) {
    %c0_i32 = arith.constant 0 : i32
    %c0_i32_0 = arith.constant 0 : i32
    %c0_i32_1 = arith.constant 0 : i32
    return %c0_i32, %c0_i32_0 : i32, i32
  }
  func.func @transform_11(%arg0: i32) -> (i32, i32) {
    %c0_i32 = arith.constant 0 : i32
    %c0_i32_0 = arith.constant 0 : i32
    %c0_i32_1 = arith.constant 0 : i32
    return %c0_i32, %c0_i32_0 : i32, i32
  }
  func.func @transform_12(%arg0: i32) -> (i32, i32) {
    %c0_i32 = arith.constant 0 : i32
    %c0_i32_0 = arith.constant 0 : i32
    %c0_i32_1 = arith.constant 0 : i32
    return %c0_i32, %c0_i32_0 : i32, i32
  }
  func.func @transform_13(%arg0: i32) -> (i32, i32) {
    %c0_i32 = arith.constant 0 : i32
    %c0_i32_0 = arith.constant 0 : i32
    %c0_i32_1 = arith.constant 0 : i32
    return %c0_i32, %c0_i32_0 : i32, i32
  }
  func.func @transform_14(%arg0: i32) -> (i32, i32) {
    %c0_i32 = arith.constant 0 : i32
    %c0_i32_0 = arith.constant 0 : i32
    return %arg0, %c0_i32 : i32, i32
  }
  func.func @transform_15(%arg0: i32) -> (i32, i32) {
    %c0_i32 = arith.constant 0 : i32
    %c0_i32_0 = arith.constant 0 : i32
    return %arg0, %c0_i32 : i32, i32
  }
}

</mosaic_0001>

<bundles_post_ra>
// kernel: tpu_custom_call.1
= control target key start
LH: loop header
LB: loop body
LE: loop exit
PB: predicated region body
PF: predicated region fallthrough
CT: control target
= control target key end

     0   :  { %s4229_s0 = inlined_call_operand.vmem [shape: bf16[64,128], index: 0, kind: input, shape index: {}]   ;;  %s4230_s1 = inlined_call_operand.vmem [shape: bf16[64,32], index: 1, kind: input, shape index: {}]   ;;  %s4231_s2 = inlined_call_operand.vmem [shape: bf16[32,32], index: 2, kind: input, shape index: {}]   ;;  %s4232_s3 = inlined_call_operand.vmem [shape: f32[32,1], index: 3, kind: input, shape index: {}]   ;;  %s4233_s4 = inlined_call_operand.hbm [shape: bf16[4,128,128], index: 4, kind: input, shape index: {}]   ;;  %s4234_s5 = inlined_call_operand.vmem [shape: f32[4,128], index: 5, kind: input, shape index: {}]   ;;  %s4235_s6 = inlined_call_operand.hbm [shape: bf16[4,128,128], index: 6, kind: input, shape index: {}]   ;;  %s4236_s7 = inlined_call_operand.hbm [shape: f32[4,128], index: 7, kind: input, shape index: {}]   ;;  %s4237_s8 = inlined_call_operand.hbm [shape: f32[3,128], index: 8, kind: input, shape index: {}]   ;;  %s4238_s9 = inlined_call_operand.hbm [shape: f32[3,128], index: 9, kind: input, shape index: {}]   ;;  %s4239_s10 = inlined_call_operand.vmem [shape: bf16[128,128], index: 10, kind: input, shape index: {}]   ;;  %s4240_s11 = inlined_call_operand.vmem [shape: f32[1,128], index: 11, kind: input, shape index: {}]   ;;  %s4241_s12 = inlined_call_operand.hbm [shape: bf16[128,128], index: 12, kind: input, shape index: {}]   ;;  %s4242_s13 = inlined_call_operand.vmem [shape: f32[1,128], index: 13, kind: input, shape index: {}]   ;;  %s4243_s14 = inlined_call_operand.hbm [shape: f32[64,128], index: 14, kind: output, shape index: {0}]   ;;  %s4244_s15 = inlined_call_operand.hbm [shape: f32[32,128], index: 15, kind: output, shape index: {1}]  }
   0x1   :  { %4258 = sst [smem:[#allocation29_spill]] %s4235_s6 }
   0x2   :  { %4259 = sst [smem:[#allocation30_spill]] %s4240_s11 }
   0x3   :  { %4260 = sst [smem:[#allocation31_spill]] %s4242_s13 }
   0x4   :  { %4261 = sst [smem:[#allocation32_spill]] %s4243_s14 }
   0x5   :  { %4262 = sst [smem:[#allocation33_spill]] %s4244_s15 }
   0x6   :  { %21 = vsyncpa [#allocation3], 0 }
   0x7   :  { %22 = vsyncpa [#allocation6], 0 }
   0x8   :  { %23 = vsyncpa [#allocation9], 0 }
   0x9   :  { %24 = vsyncpa [#allocation12], 0 }
   0xa   :  { %25 = vsyncpa [#allocation4], 0 }
   0xb   :  { %27 = vsyncpa [#allocation4 + $0x1], 0 }
   0xc   :  { %28 = vsyncpa [#allocation15], 0 }
   0xd   :  { %30 = vsyncpa [#allocation15 + $0x1], 0  ;;  %s3760_s18 = smov 0   ;;  %s3762_s19 = smov 0  }
   0xe   :  { %s3764_s20 = smov 0   ;;  %s3766_s21 = smov 0  }
   0xf LB: > { %4263 = sst [smem:[#allocation22_spill]] %s3651_s18  ;;  %s3781_s22 = sadd.s32 4294967295, %s3663_s21   ;;  %s3663_s21 = sphi %s3766_s21, %s4296_s21   ;;  %s3659_s20 = sphi %s3764_s20, %s4298_s20   ;;  %s3655_s19 = sphi %s3762_s19, %s4300_s19   ;;  %s3651_s18 = sphi %s3760_s18, %s4299_s18  }
  0x10   : > { %4264 = sst [smem:[#allocation23_spill]] %s3659_s20  ;;  %s2648_s23 = sadd.s32 4294967294, %s3663_s21  }
  0x11   : > { %4265 = sst [smem:[#allocation24_spill]] %s3663_s21  ;;  %s3785_s24 = sadd.s32 1, %s3663_s21  }
  0x12   : > { %4266 = sst [smem:[#allocation25_spill]] %s3785_s24  ;;  %s357_s25 = sadd.s32 1, %s3659_s20 }
  0x13   : > { %s354_s26 = ssub.s32 %s3663_s21, %s3785_s24  ;;  %p367_p0 = scmp.ne.s32.totalorder %s3659_s20, %s3655_s19 }
  0x14   : > { %p355_p1 = scmp.eq.s32.totalorder %s354_s26, 0  ;;  %p368_p2 = scmp.eq.s32.totalorder %s3781_s22, 1 }
  0x15   : > { %p373_p3 = scmp.ne.s32.totalorder %s3655_s19, %s3651_s18  ;;  %p374_p4 = scmp.eq.s32.totalorder %s2648_s23, 1 }
  0x16   : > { %s3796_s27 = scalar_select %p355_p1, %s3659_s20, %s357_s25  }
  0x17   : > { %p3798_p5 = por %p368_p2, %p367_p0  ;;  %p3802_p6 = por %p374_p4, %p373_p3 }
  0x18   : > { %4267 = sst [smem:[#allocation26_spill]] %s3796_s27  ;;  %p2649_p7 = scmp.ge.s32.totalorder %s3663_s21, 1 }
  0x19   : > { %s4268_s28 = scalar_select %p3798_p5, 1, 0 }
  0x1a   : > { %s4270_s29 = scalar_select %p3802_p6, 1, 0 }
  0x1b   : > { %4269 = sst [smem:[#allocation27_spill]] %s4268_s28  ;;  %p407_p8 = scmp.lt.s32.totalorder %s3663_s21, 3 }
  0x1c   : > { %4271 = sst [smem:[#allocation28_spill]] %s4270_s29  ;;  %p4252_p9 = scmp.eq.s32.totalorder %s3781_s22, 0 }
  0x1d   : > { %p3809_p10 = pnand %p2649_p7, %p407_p8  ;;  %s3665_s16 = smov [#allocation5]  }
  0x1e   : > { %s435_s17 = sshll.u32 %s3665_s16, 4  ;;  %s3666_s25 = smov [#allocation8]   ;;  %s3815_s17 = int_to_ptr.vmem [resolvable:$true] %s435_s17 }
  0x1f   : > { %s4272_s30 = scalar_select %p3809_p10, 1, 0 }
  0x20   : > { %p3180_p11 = pneg %p3809_p10  ;;  %s460_s26 = sshll.u32 %s3666_s25, 4  ;;  %s3823_s26 = int_to_ptr.vmem [resolvable:$true] %s460_s26 }
  0x21   : > { %s3667_s27 = smov [#allocation2]   ;;  %s4274_s6 = sld [smem:[#allocation29_spill]] }
  0x22   : > { %p3819_p12 = pnand %p4252_p9, %p3180_p11  ;;  %s3825_s20 = sshll.u32 %s3667_s27, 4  ;;  %s420_s20 = int_to_ptr.vmem [resolvable:$true] %s3825_s20 }
  0x24   : > { %p3835_p0 = pneg %p3819_p12 }
  0x27   : > { %s3385_s18 = scalar_lea.hbm %s4274_s6, 4096 }
  0x28   : > { %p3386_p13 = scmp.ne.s32.totalorder %s4274_s6, %s3385_s18  ;;  %p3392_p3 = scmp.lt.u32.totalorder %s3385_s18, %s4274_s6 }
  0x2a   : > { %p3388_p1 = pnand %p3835_p0, %p3386_p13 }
  0x2c   : > { %p3389_p2 = pneg %p3388_p1 }
  0x2e   : > { %p3394_p4 = pnand %p3392_p3, %p3389_p2 }
  0x30   : > { %3397 = shalt.err (!%p3394_p4)
}
  0x31   : > { %s3398_s21 = scalar_lea.vmem %s3815_s17, 4096  ;;  %p3406_p9 = scmp.lt.s32.totalorder %s3815_s17, %s3815_s17 }
  0x32   : > { %p3399_p7 = scmp.ne.s32.totalorder %s3815_s17, %s3398_s21  ;;  %p3407_p6 = scmp.lt.s32.totalorder %s3398_s21, %s3398_s21 }
  0x34   : > { %p3401_p8 = pnand %p3399_p7, %p3835_p0  ;;  %p3408_p13 = por %p3407_p6, %p3406_p9 }
  0x36   : > { %p3402_p11 = pneg %p3401_p8 }
  0x38   : > { %p3409_p1 = pnand %p3408_p13, %p3402_p11 }
  0x3a   : > { %3412 = shalt.err (!%p3409_p1)
}
  0x3b   : > { %s3668_s24 = smov 64   ;;  %s3669_s18 = smov 4  }
  0x3c   : > { %3186 = dma.hbm_to_vmem [thread:$0]  (!%p3819_p12), %s4274_s6, 4096, %s3815_s17, [#allocation6], %s3668_s24, %s3668_s24, %s3669_s18  }
  0x3d   : > { %s3413_s21 = scalar_lea.hbm %s4237_s8, 64 }
  0x3e   : > { %p3414_p6 = scmp.ne.s32.totalorder %s4237_s8, %s3413_s21  ;;  %p3420_p3 = scmp.lt.u32.totalorder %s3413_s21, %s4237_s8 }
  0x40   : > { %p3416_p9 = pnand %p3414_p6, %p3835_p0 }
  0x42   : > { %p3417_p2 = pneg %p3416_p9 }
  0x44   : > { %p3422_p4 = pnand %p3420_p3, %p3417_p2 }
  0x46   : > { %3425 = shalt.err (!%p3422_p4)
}
  0x47   : > { %s3426_s17 = scalar_lea.vmem %s3823_s26, 64  ;;  %p3434_p13 = scmp.lt.s32.totalorder %s3823_s26, %s3823_s26 }
  0x48   : > { %p3427_p7 = scmp.ne.s32.totalorder %s3823_s26, %s3426_s17  ;;  %p3435_p1 = scmp.lt.s32.totalorder %s3426_s17, %s3426_s17 }
  0x4a   : > { %p3429_p8 = pnand %p3427_p7, %p3835_p0  ;;  %p3436_p6 = por %p3435_p1, %p3434_p13 }
  0x4c   : > { %p3430_p11 = pneg %p3429_p8 }
  0x4e   : > { %p3437_p9 = pnand %p3436_p6, %p3430_p11 }
  0x50   : > { %3440 = shalt.err (!%p3437_p9)
}
  0x51   : > { %3192 = dma.hbm_to_vmem [thread:$0]  (!%p3819_p12), %s4237_s8, 64, %s3823_s26, [#allocation9]  }
  0x52   : > { %s3441_s29 = scalar_lea.hbm %s4233_s4, 4096 }
  0x53   : > { %p3442_p2 = scmp.ne.s32.totalorder %s4233_s4, %s3441_s29  ;;  %p3448_p7 = scmp.lt.u32.totalorder %s3441_s29, %s4233_s4 }
  0x55   : > { %p3444_p3 = pnand %p3442_p2, %p3835_p0 }
  0x57   : > { %p3445_p4 = pneg %p3444_p3 }
  0x59   : > { %p3450_p8 = pnand %p3448_p7, %p3445_p4 }
  0x5b   : > { %3453 = shalt.err (!%p3450_p8)
}
  0x5c   : > { %s3454_s17 = scalar_lea.vmem %s420_s20, 4096  ;;  %p3462_p6 = scmp.lt.s32.totalorder %s420_s20, %s420_s20 }
  0x5d   : > { %p3455_p11 = scmp.ne.s32.totalorder %s420_s20, %s3454_s17  ;;  %p3463_p9 = scmp.lt.s32.totalorder %s3454_s17, %s3454_s17 }
  0x5f   : > { %p3457_p13 = pnand %p3455_p11, %p3835_p0  ;;  %p3464_p5 = por %p3463_p9, %p3462_p6 }
  0x61   : > { %p3458_p1 = pneg %p3457_p13 }
  0x63   : > { %p3465_p10 = pnand %p3464_p5, %p3458_p1 }
  0x65   : > { %3468 = shalt.err (!%p3465_p10)
}
  0x66   : > { %3183 = dma.hbm_to_vmem [thread:$0]  (!%p3819_p12), %s4233_s4, 4096, %s420_s20, [#allocation3], %s3668_s24, %s3668_s24, %s3669_s18  }
  0x67   : > { %s3670_s13 = smov [#allocation7]   ;;  %s3671_s28 = smov [#allocation10]  }
  0x68   : > { %s449_s14 = sshll.u32 %s3670_s13, 4  ;;  %s471_s29 = sshll.u32 %s3671_s28, 4  ;;  %s450_s14 = int_to_ptr.vmem [resolvable:$true] %s449_s14  ;;  %s472_s29 = int_to_ptr.vmem [resolvable:$true] %s471_s29 }
  0x69   : > { %s3469_s27 = scalar_lea.hbm %s4236_s7, 64 }
  0x6a   : > { %p3470_p5 = scmp.ne.s32.totalorder %s4236_s7, %s3469_s27  ;;  %p3476_p3 = scmp.lt.u32.totalorder %s3469_s27, %s4236_s7 }
  0x6c   : > { %p3472_p10 = pnand %p3470_p5, %p3835_p0 }
  0x6e   : > { %p3473_p2 = pneg %p3472_p10 }
  0x70   : > { %p3478_p4 = pnand %p3476_p3, %p3473_p2 }
  0x72   : > { %3481 = shalt.err (!%p3478_p4)
}
  0x73   : > { %s3482_s20 = scalar_lea.vmem %s450_s14, 64  ;;  %p3490_p13 = scmp.lt.s32.totalorder %s450_s14, %s450_s14 }
  0x74   : > { %p3483_p7 = scmp.ne.s32.totalorder %s450_s14, %s3482_s20  ;;  %p3491_p1 = scmp.lt.s32.totalorder %s3482_s20, %s3482_s20 }
  0x76   : > { %p3485_p8 = pnand %p3483_p7, %p3835_p0  ;;  %p3492_p6 = por %p3491_p1, %p3490_p13 }
  0x78   : > { %p3486_p11 = pneg %p3485_p8 }
  0x7a   : > { %p3493_p9 = pnand %p3492_p6, %p3486_p11 }
  0x7c   : > { %3496 = shalt.err (!%p3493_p9)
}
  0x7d   : > { %3189 = dma.hbm_to_vmem [thread:$0]  (!%p3819_p12), %s4236_s7, 64, %s450_s14, [#allocation6]  }
  0x7e   : > { %s3497_s16 = scalar_lea.hbm %s4238_s9, 64 }
  0x7f   : > { %p3498_p5 = scmp.ne.s32.totalorder %s4238_s9, %s3497_s16  ;;  %p3504_p3 = scmp.lt.u32.totalorder %s3497_s16, %s4238_s9 }
  0x81   : > { %p3500_p10 = pnand %p3498_p5, %p3835_p0 }
  0x83   : > { %p3501_p2 = pneg %p3500_p10 }
  0x85   : > { %p3506_p4 = pnand %p3504_p3, %p3501_p2 }
  0x87   : > { %3509 = shalt.err (!%p3506_p4)
}
  0x88   : > { %s3510_s26 = scalar_lea.vmem %s472_s29, 64  ;;  %p3518_p13 = scmp.lt.s32.totalorder %s472_s29, %s472_s29 }
  0x89   : > { %p3511_p7 = scmp.ne.s32.totalorder %s472_s29, %s3510_s26  ;;  %p3519_p1 = scmp.lt.s32.totalorder %s3510_s26, %s3510_s26 }
  0x8b   : > { %p3513_p8 = pnand %p3511_p7, %p3835_p0  ;;  %p3520_p6 = por %p3519_p1, %p3518_p13 }
  0x8d   : > { %p3514_p11 = pneg %p3513_p8 }
  0x8f   : > { %p3521_p9 = pnand %p3520_p6, %p3514_p11 }
  0x91   : > { %3524 = shalt.err (!%p3521_p9)
}
  0x92   : > { %3195 = dma.hbm_to_vmem [thread:$0]  (!%p3819_p12), %s4238_s9, 64, %s472_s29, [#allocation9]  }
  0x93   : > { %s3672_s11 = smov [#allocation11]   ;;  %s3525_s16 = scalar_lea.hbm %s4241_s12, 1024 }
  0x94   : > { %s487_s13 = sshll.u32 %s3672_s11, 4  ;;  %p3526_p5 = scmp.ne.s32.totalorder %s4241_s12, %s3525_s16  ;;  %s488_s13 = int_to_ptr.vmem [resolvable:$true] %s487_s13 }
  0x95   : > { %p3532_p3 = scmp.lt.u32.totalorder %s3525_s16, %s4241_s12 }
  0x96   : > { %p3528_p10 = pnand %p3526_p5, %p3835_p0 }
  0x98   : > { %p3529_p2 = pneg %p3528_p10 }
  0x9a   : > { %p3534_p4 = pnand %p3532_p3, %p3529_p2 }
  0x9c   : > { %3537 = shalt.err (!%p3534_p4)
}
  0x9d   : > { %s3538_s29 = scalar_lea.vmem %s488_s13, 1024  ;;  %p3546_p13 = scmp.lt.s32.totalorder %s488_s13, %s488_s13 }
  0x9e   : > { %p3539_p7 = scmp.ne.s32.totalorder %s488_s13, %s3538_s29  ;;  %p3547_p1 = scmp.lt.s32.totalorder %s3538_s29, %s3538_s29 }
  0xa0   : > { %p3541_p8 = pnand %p3539_p7, %p3835_p0  ;;  %p3548_p6 = por %p3547_p1, %p3546_p13 }
  0xa2   : > { %p3542_p11 = pneg %p3541_p8 }
  0xa4   : > { %p3549_p9 = pnand %p3548_p6, %p3542_p11 }
  0xa6   : > { %3552 = shalt.err (!%p3549_p9)
}
  0xa7   : > { %3198 = dma.hbm_to_vmem [thread:$0]  (!%p3819_p12), %s4241_s12, 1024, %s488_s13, [#allocation12], %s3668_s24, %s3668_s24, %s3669_s18  }
  0xa8   : > { %p4276_p5 = scmp.ne.s32.totalorder %s4272_s30, 0 }
  0xa9   : > { %p4277_p0 = scmp.eq.s32.totalorder (!%p4276_p5), %s3781_s22, 0 }
  0xaa   : > { %542 = sbr.rel (%p4276_p5) target bundleno = 4804 (0x12c4), region = 76 }
  0xb1   : > { %3626 = dma.done.wait (%p4277_p0), [#allocation3], 4096   ;;  %p4278_p10 = pmov %p4277_p0 }
  0xb2   : > { %p4279_p2 = pmov %p4277_p0 }
  0xb3   : > { %3628 = vsyncadd (%p4278_p10), [#allocation3], 4294963200 }
  0xb4   : > { %3630 = dma.done.wait (%p4279_p2), [#allocation6], 4160   ;;  %p4280_p3 = pmov %p4277_p0 }
  0xb5   : > { %p4281_p4 = pmov %p4277_p0 }
  0xb6   : > { %3632 = vsyncadd (%p4280_p3), [#allocation6], 4294963136 }
  0xb7   : > { %3634 = dma.done.wait (%p4281_p4), [#allocation9], 128   ;;  %p4282_p12 = pmov %p4277_p0 }
  0xb8   : > { %p4283_p7 = pmov %p4277_p0 }
  0xb9   : > { %3636 = vsyncadd (%p4282_p12), [#allocation9], 4294967168 }
  0xba   : > { %3638 = dma.done.wait (%p4283_p7), [#allocation12], 1024   ;;  %p4284_p8 = pmov %p4277_p0 }
  0xbb   : > { %s2666_s15 = sshll.u32 %s3781_s22, 2  ;;  %vm692_vm0 = vcmask 261120   ;;  %v3270_v3 = vld [vmem:[#allocation2] sm:$0xff]   ;;  %v3271_v4 = vld [vmem:[#allocation2 + $0x8] sm:$0xff]   ;;  %v3272_v6 = vld [vmem:[#allocation2 + $0x10] sm:$0xff]   ;;  %v665_v54 = vlaneseq  ;;  %v3673_v60 = vmov 0.0  }
  0xbc   : > { %3640 = vsyncadd (%p4284_p8), [#allocation12], 4294966272  ;;  %p631_p11 = scmp.lt.s32.totalorder %s2666_s15, 7  ;;  %2920 = vmatprep.subr.bf16.mxu1 %v3270_v3  ;;  %v3273_v7 = vld [vmem:[#allocation2 + $0x18] sm:$0xff]   ;;  %v3274_v8 = vld [vmem:[#allocation2 + $0x20] sm:$0xff]   ;;  %s2670_s26 = sshll.u32 %s3781_s22, 1 }
  0xbd   : > { %2921 = vmatpush3.bf16.msra.mxu1 %v3270_v3  ;;  %v3275_v9 = vld [vmem:[#allocation2 + $0x28] sm:$0xff]   ;;  %v3276_v10 = vld [vmem:[#allocation2 + $0x30] sm:$0xff]   ;;  %v3277_v11 = vld [vmem:[#allocation2 + $0x38] sm:$0xff]   ;;  %v4003_v55 = vand.u32 127, %v665_v54  ;;  %p643_p13 = scmp.lt.s32.totalorder %s2670_s26, 3  ;;  %vm3674_vm2 = vmmov 0  }
  0xbe   : > { %s4302_s15 = smov (!%p631_p11, %s2666_s15), 7  ;;  %2922 = vmatprep.subr.bf16.mxu1 %v3271_v4  ;;  %v3278_v12 = vld [vmem:[#allocation5] sm:$0xff]   ;;  %v3279_v13 = vld [vmem:[#allocation5 + $0x8] sm:$0xff]   ;;  %v3280_v14 = vld [vmem:[#allocation5 + $0x10] sm:$0xff]   ;;  %s4285_s16 = sld [smem:[#allocation30_spill]] }
  0xbf   : > { %s2667_s30 = sshll.u32 %s4302_s15, 2  ;;  %v3281_v15 = vld [vmem:[#allocation5 + $0x18] sm:$0xff]   ;;  %v3282_v16 = vld [vmem:[#allocation5 + $0x20] sm:$0xff]   ;;  %v3283_v17 = vld [vmem:[#allocation5 + $0x28] sm:$0xff]   ;;  %vm667_vm1 = vcmp.lt.s32.totalorder %v4003_v55, 75  ;;  %s4304_s26 = smov (!%p643_p13, %s2670_s26), 3 }
  0xc0   : > { %s634_s18 = scalar_lea.vmem %s4229_s0, %s2667_s30  ;;  %s3986_s13 = scalar_lea.vmem %s4230_s1, %s2667_s30  ;;  %v3284_v24 = vld [vmem:[#allocation5 + $0x30] sm:$0xff]   ;;  %v3285_v25 = vld [vmem:[#allocation5 + $0x38] sm:$0xff]   ;;  %v2681_v26 = vld [vmem:[%s4234_s5] ss:$0 sm:$0xff]  ;;  %v4007_v61 = vsel %vm667_vm1, 1.0, %v3673_v60  ;;  %vm2394_vm3 = vcmp.lt.s32.totalorder %v4003_v55, 4 }
  0xc1   : > { %v3266_v0 = vld [vmem:[%s634_s18] sm:$0xff]   ;;  %v3267_v1 = vld [vmem:[%s634_s18 + $0x8] sm:$0xff]   ;;  %2923 = vmatpush3.bf16.msra.mxu1 %v3271_v4  ;;  %s2671_s14 = sshll.u32 %s4304_s26, 2  ;;  %s2673_s24 = sshll.u32 %s4304_s26, 3 }
  0xc2   : > { %2912 = vmatprep.subr.bf16.mxu0 %v3266_v0  ;;  %v3989_v2 = vld [vmem:[%s3986_s13] sm:$0xff]   ;;  %v3994_v5 = vld [vmem:[%s3986_s13 + $0x8] sm:$0xff]   ;;  %2924 = vmatprep.subr.bf16.mxu1 %v3272_v6  ;;  %s4056_s23 = scalar_lea.vmem %s4231_s2, %s2671_s14  ;;  %s652_s6 = scalar_lea.vmem %s4232_s3, %s2673_s24 }
  0xc3   : > { %2913 = vmatpush3.bf16.msra.mxu0 %v3266_v0  ;;  %2916 = vmatprep.mubr.msk.bf16.mxu0 %vm692_vm0, %v3989_v2  ;;  %v2690_v41 = vld [vmem:[#allocation7] ss:$0 sm:$0xff]  ;;  %s4088_s30 = sand.u32 1, %s3655_s19   ;;  %s4286_s21 = sld [smem:[#allocation31_spill]] }
  0xc4   : > { %2914 = vmatprep.subr.bf16.mxu0 %v3267_v1  ;;  %s2664_s24 = sshll.u32 %s4088_s30, 5  ;;  %s4287_s17 = sld [smem:[#allocation27_spill]] }
  0xc5   : > { %2925 = vmatpush3.bf16.msra.mxu1 %v3272_v6  ;;  %s4091_s18 = scalar_lea.vmem [#allocation13], %s2664_s24  ;;  %s2793_s26 = sshll.u32 %s3781_s22, 9 }
  0xc6   : > { %2926 = vmatprep.subr.bf16.mxu1 %v3273_v7  ;;  %s2442_s29 = sshll.u32 %s4091_s18, 4  ;;  %s4288_s24 = sld [smem:[#allocation32_spill]]  ;;  %s4135_s29 = int_to_ptr.vmem [resolvable:$true] %s2442_s29 }
  0xc7   : > { %2915 = vmatpush3.bf16.msra.mxu0 %v3267_v1  ;;  %s2424_s11 = scalar_lea.sflag [#allocation4], %s4088_s30 }
  0xc8   : > { %2940 = vmatprep.subr.bf16.mxu0 %v3278_v12 }
  0xc9   : > { %2927 = vmatpush3.bf16.msra.mxu1 %v3273_v7 }
  0xca   : > { %2917 = vmatmul.mubr.msk.bf16.vlgmr.msra.gmra.mrb[0].mxu0 %vm692_vm0, %v3994_v5  ;;  %2928 = vmatprep.subr.bf16.mxu1 %v3274_v8  ;;  %p4289_p6 = scmp.ne.s32.totalorder %s4287_s17, 0 }
  0xcb   : > { %2941 = vmatpush3.bf16.msra.mxu0 %v3278_v12 }
  0xcc   : > { %2942 = vmatprep.subr.bf16.mxu0 %v3279_v13  ;;  %s4141_s20 = scalar_lea.hbm %s4288_s24, %s2793_s26 }
  0xcd   : > { %2929 = vmatpush3.bf16.msra.mxu1 %v3274_v8 }
  0xce   : > { %2930 = vmatprep.subr.bf16.mxu1 %v3275_v9 }
  0xcf   : > { %2943 = vmatpush3.bf16.msra.mxu0 %v3279_v13 }
  0xd0   : > { %2944 = vmatprep.subr.bf16.mxu0 %v3280_v14 }
  0xd1   : > { %2931 = vmatpush3.bf16.msra.mxu1 %v3275_v9 }
  0xd2   : > { %2932 = vmatprep.subr.bf16.mxu1 %v3276_v10 }
  0xd3   : > { %2945 = vmatpush3.bf16.msra.mxu0 %v3280_v14 }
  0xd4   : > { %2946 = vmatprep.subr.bf16.mxu0 %v3281_v15 }
  0xd5   : > { %2933 = vmatpush3.bf16.msra.mxu1 %v3276_v10 }
  0xd6   : > { %2934 = vmatprep.subr.bf16.mxu1 %v3277_v11 }
  0xd7   : > { %2947 = vmatpush3.bf16.msra.mxu0 %v3281_v15 }
  0xd8   : > { %2948 = vmatprep.subr.bf16.mxu0 %v3282_v16 }
  0xd9   : > { %2935 = vmatpush3.bf16.msra.mxu1 %v3277_v11 }
  0xdb   : > { %2949 = vmatpush3.bf16.msra.mxu0 %v3282_v16  ;;  %v3286_v16 = vld [vmem:[#allocation2 + $0x40] sm:$0xff]  }
  0xdc   : > { %2950 = vmatprep.subr.bf16.mxu0 %v3283_v17 }
  0xdf   : > { %2951 = vmatpush3.bf16.msra.mxu0 %v3283_v17  ;;  %v3287_v17 = vld [vmem:[#allocation2 + $0x48] sm:$0xff]  }
  0xe0   : > { %2952 = vmatprep.subr.bf16.mxu0 %v3284_v24 }
  0xe3   : > { %2953 = vmatpush3.bf16.msra.mxu0 %v3284_v24 }
  0xe4   : > { %2954 = vmatprep.subr.bf16.mxu0 %v3285_v25 }
  0xe7   : > { %2955 = vmatpush3.bf16.msra.mxu0 %v3285_v25 }
  0xe8   : > { %2968 = vmatprep.subr.bf16.mxu0 %v3286_v16 }
 0x19d   : > { %v2918_v18 = vpop.f32.mrb[0].mxu0 }
 0x19e   : > { %v733_v19 = vpop.f32.mrb[1].mxu0 }
 0x19f   : > { %v2919_v20 = vpop.f32.mrb[2].mxu0 }
 0x1a0   : > { %v749_v21 = vpack.c.bf16 %v2919_v20, %v2918_v18  ;;  %v736_v22 = vpop.f32.mrb[3].mxu0  ;;  %v3288_v18 = vld [vmem:[#allocation2 + $0x50] sm:$0xff]   ;;  %v3290_v20 = vld [vmem:[#allocation2 + $0x60] sm:$0xff]  }
 0x1a1   : > { %v748_v23 = vpack.c.bf16 %v736_v22, %v733_v19  ;;  %v3289_v19 = vld [vmem:[#allocation2 + $0x58] sm:$0xff]   ;;  %v3292_v22 = vld [vmem:[#allocation2 + $0x70] sm:$0xff]  }
 0x1a3   : > { %2936 = vmatprep.mubr.bf16.mxu1 %v748_v23 }
 0x1a4   : > { %2937 = vmatmul.mubr.bf16.vlgmr.msra.gmra.mrb[0].mxu1 %v749_v21  ;;  %v3291_v21 = vld [vmem:[#allocation2 + $0x68] sm:$0xff]  }
 0x1a5   : > { %2964 = vmatprep.mubr.msk.bf16.mxu1 %vm692_vm0, %v3989_v2 }
 0x277   : > { %v2938_v27 = vpop.f32.mrb[0].mxu1 }
 0x278   : > { %v862_v28 = vadd.f32 %v2938_v27, %v2681_v26  ;;  %v853_v29 = vpop.f32.mrb[1].mxu1 }
 0x279   : > { %v854_v30 = vadd.f32 %v2681_v26, %v853_v29  ;;  %v2939_v31 = vpop.f32.mrb[2].mxu1 }
 0x27a   : > { %v865_v32 = vadd.f32 %v2939_v31, %v2681_v26  ;;  %v856_v33 = vpop.f32.mrb[3].mxu1  ;;  %v870_v35 = vmax.f32 %v862_v28, 0.0 }
 0x27b   : > { %v857_v34 = vadd.f32 %v2681_v26, %v856_v33  ;;  %v868_v37 = vmax.f32 %v854_v30, 0.0 }
 0x27c   : > { %v871_v36 = vmax.f32 %v865_v32, 0.0 }
 0x27d   : > { %v869_v38 = vmax.f32 %v857_v34, 0.0 }
 0x27e   : > { %v873_v39 = vpack.c.bf16 %v871_v36, %v870_v35 }
 0x27f   : > { %v872_v40 = vpack.c.bf16 %v869_v38, %v868_v37  ;;  %v2699_v37 = vld [vmem:[#allocation8] ss:$0 sm:$0xff] }
 0x281   : > { %2956 = vmatprep.mubr.bf16.mxu0 %v872_v40 }
 0x282   : > { %2957 = vmatmul.mubr.bf16.vlgmr.msra.gmra.mrb[4].mxu0 %v873_v39 }
 0x283   : > { %2969 = vmatpush3.bf16.msra.mxu0 %v3286_v16 }
 0x284   : > { %2970 = vmatprep.subr.bf16.mxu0 %v3287_v17 }
 0x287   : > { %2971 = vmatpush3.bf16.msra.mxu0 %v3287_v17 }
 0x288   : > { %2972 = vmatprep.subr.bf16.mxu0 %v3288_v18 }
 0x28b   : > { %2973 = vmatpush3.bf16.msra.mxu0 %v3288_v18 }
 0x28c   : > { %2974 = vmatprep.subr.bf16.mxu0 %v3289_v19 }
 0x28f   : > { %2975 = vmatpush3.bf16.msra.mxu0 %v3289_v19 }
 0x290   : > { %2976 = vmatprep.subr.bf16.mxu0 %v3290_v20 }
 0x293   : > { %2977 = vmatpush3.bf16.msra.mxu0 %v3290_v20 }
 0x294   : > { %2978 = vmatprep.subr.bf16.mxu0 %v3291_v21 }
 0x297   : > { %2979 = vmatpush3.bf16.msra.mxu0 %v3291_v21 }
 0x298   : > { %2980 = vmatprep.subr.bf16.mxu0 %v3292_v22 }
 0x29b   : > { %2981 = vmatpush3.bf16.msra.mxu0 %v3292_v22 }
 0x355   : > { %v2958_v42 = vpop.f32.mrb[4].mxu0 }
 0x356   : > { %v986_v43 = vadd.f32 %v2958_v42, %v2690_v41  ;;  %v977_v44 = vpop.f32.mrb[5].mxu0  ;;  %v2700_v42 = vld [vmem:[#allocation10] ss:$0 sm:$0xff] }
 0x357   : > { %v978_v45 = vadd.f32 %v2690_v41, %v977_v44  ;;  %v2959_v46 = vpop.f32.mrb[6].mxu0 }
 0x358   : > { %v994_v47 = vmax.f32 %v986_v43, 0.0  ;;  %v989_v48 = vadd.f32 %v2959_v46, %v2690_v41  ;;  %v980_v49 = vpop.f32.mrb[7].mxu0 }
 0x359   : > { %v992_v50 = vmax.f32 %v978_v45, 0.0  ;;  %v981_v51 = vadd.f32 %v2690_v41, %v980_v49 }
 0x35a   : > { %1000 = vadd.xlane.f32.xlu1 %v994_v47  ;;  %v995_v52 = vmax.f32 %v989_v48, 0.0 }
 0x35b   : > { %996 = vadd.xlane.f32.xlu0 %v992_v50  ;;  %v993_v53 = vmax.f32 %v981_v51, 0.0 }
 0x35e   : > { %1002 = vadd.xlane.f32.xlu1 %v995_v52 }
 0x35f   : > { %998 = vadd.xlane.f32.xlu0 %v993_v53 }
 0x3e7   : > { %v1001_v56 = vpop.xlane.xlu1 %1000 }
 0x3e8   : > { %v1006_v57 = vmul.f32 0.013333334, %v1001_v56  ;;  %v997_v58 = vpop.xlane.xlu0 %996  ;;  %v3293_v56 = vld [vmem:[#allocation2 + $0x78] sm:$0xff]  }
 0x3e9   : > { %v1004_v59 = vmul.f32 0.013333334, %v997_v58  ;;  %2982 = vmatprep.subr.bf16.mxu0 %v3293_v56  ;;  %v3295_v58 = vld [vmem:[#allocation5 + $0x48] sm:$0xff]  }
 0x3ea   : > { %v4009_v62 = vsub.f32 %v994_v47, %v1006_v57  ;;  %2983 = vmatpush3.bf16.msra.mxu0 %v3293_v56  ;;  %v3294_v57 = vld [vmem:[#allocation5 + $0x40] sm:$0xff]  }
 0x3eb   : > { %v1008_v63 = vsub.f32 %v992_v50, %v1004_v59  ;;  %v1003_v0 = vpop.xlane.xlu1 %1002  ;;  %v3296_v59 = vld [vmem:[#allocation5 + $0x50] sm:$0xff]  }
 0x3ec   : > { %v1007_v1 = vmul.f32 0.013333334, %v1003_v0  ;;  %v999_v3 = vpop.xlane.xlu0 %998  ;;  %v1014_v10 = vmul.f32 %v4007_v61, %v4009_v62  ;;  %v3299_v0 = vld [vmem:[#allocation5 + $0x68] sm:$0xff]  }
 0x3ed   : > { %v1005_v4 = vmul.f32 0.013333334, %v999_v3  ;;  %v1012_v6 = vmul.f32 %v4007_v61, %v1008_v63 }
 0x3ee   : > { %v4012_v7 = vsub.f32 %v995_v52, %v1007_v1  ;;  %v1018_v12 = vmul.f32 %v1014_v10, %v1014_v10  ;;  %v3301_v10 = vld [vmem:[#allocation5 + $0x78] sm:$0xff]  }
 0x3ef   : > { %v1009_v8 = vsub.f32 %v993_v53, %v1005_v4  ;;  %v1016_v9 = vmul.f32 %v1012_v6, %v1012_v6 }
 0x3f0   : > { %v1015_v14 = vmul.f32 %v4007_v61, %v4012_v7 }
 0x3f1   : > { %1020 = vadd.xlane.f32.xlu0 %v1016_v9  ;;  %v1013_v11 = vmul.f32 %v4007_v61, %v1009_v8  ;;  %v3300_v9 = vld [vmem:[#allocation5 + $0x70] sm:$0xff]  }
 0x3f2   : > { %v1019_v15 = vmul.f32 %v1015_v14, %v1015_v14 }
 0x3f3   : > { %v1017_v13 = vmul.f32 %v1013_v11, %v1013_v11  ;;  %v2703_v11 = vld [vmem:[%s4234_s5 + $0x1] ss:$0 sm:$0xff] }
 0x3f5   : > { %1024 = vadd.xlane.f32.xlu0 %v1018_v12  ;;  %1022 = vadd.xlane.f32.xlu1 %v1017_v13 }
 0x3f9   : > { %1026 = vadd.xlane.f32.xlu1 %v1019_v15 }
 0x47e   : > { %v1021_v23 = vpop.xlane.xlu0 %1020 }
 0x47f   : > { %v1028_v24 = vmul.f32 0.013333334, %v1021_v23 }
 0x481   : > { %v1032_v25 = vadd.f32 1e-05, %v1028_v24 }
 0x482   : > { %v1023_v26 = vpop.xlane.xlu1 %1022  ;;  %v1025_v27 = vpop.xlane.xlu0 %1024 }
 0x483   : > { %3351 = vrsqrt.f32 %v1032_v25  ;;  %v1029_v28 = vmul.f32 0.013333334, %v1023_v26  ;;  %v1030_v29 = vmul.f32 0.013333334, %v1025_v27  ;;  %v2712_v25 = vld [vmem:[#allocation7 + $0x1] ss:$0 sm:$0xff] }
 0x485   : > { %v1033_v30 = vadd.f32 1e-05, %v1029_v28  ;;  %v1034_v31 = vadd.f32 1e-05, %v1030_v29 }
 0x486   : > { %v1027_v32 = vpop.xlane.xlu1 %1026 }
 0x487   : > { %3353 = vrsqrt.f32 %v1033_v30  ;;  %v1031_v33 = vmul.f32 0.013333334, %v1027_v32 }
 0x488   : > { %3355 = vrsqrt.f32 %v1034_v31 }
 0x489   : > { %v1035_v34 = vadd.f32 1e-05, %v1031_v33 }
 0x48b   : > { %3357 = vrsqrt.f32 %v1035_v34 }
 0x48d   : > { %v3352_v35 = vpop.eup %3351 }
 0x48e   : > { %v1040_v36 = vmul.f32 %v3352_v35, %v1008_v63  ;;  %v3298_v63 = vld [vmem:[#allocation5 + $0x60] sm:$0xff]  }
 0x490   : > { %v1049_v41 = vmul.f32 %v2699_v37, %v1040_v36 }
 0x491   : > { %v3354_v38 = vpop.eup %3353 }
 0x492   : > { %v3356_v39 = vpop.eup %3355  ;;  %v1041_v40 = vmul.f32 %v3354_v38, %v1009_v8  ;;  %v1058_v46 = vadd.f32 %v2700_v42, %v1049_v41 }
 0x493   : > { %v1042_v43 = vmul.f32 %v3356_v39, %v4009_v62  ;;  %v3297_v62 = vld [vmem:[#allocation5 + $0x58] sm:$0xff]  }
 0x494   : > { %v1050_v44 = vmul.f32 %v2699_v37, %v1041_v40 }
 0x495   : > { %v3358_v45 = vpop.eup %3357  ;;  %v1051_v49 = vmul.f32 %v2699_v37, %v1042_v43 }
 0x496   : > { %v1059_v47 = vadd.f32 %v2700_v42, %v1050_v44  ;;  %v1043_v48 = vmul.f32 %v3358_v45, %v4012_v7 }
 0x497   : > { %v1060_v52 = vadd.f32 %v2700_v42, %v1051_v49 }
 0x498   : > { %v1062_v50 = vpack.c.bf16 %v1059_v47, %v1058_v46  ;;  %v1052_v51 = vmul.f32 %v2699_v37, %v1043_v48 }
 0x49a   : > { %2960 = vmatprep.subr.bf16.mxu1 %v1062_v50  ;;  %v1061_v53 = vadd.f32 %v2700_v42, %v1052_v51 }
 0x49b   : > { %2961 = vmatpush3.bf16.msra.mxu1 %v1062_v50 }
 0x49c   : > { %v1063_v54 = vpack.c.bf16 %v1061_v53, %v1060_v52 }
 0x49e   : > { %2962 = vmatprep.subr.bf16.mxu1 %v1063_v54 }
 0x49f   : > { %2963 = vmatpush3.bf16.msra.mxu1 %v1063_v54 }
 0x4a0   : > { %2988 = vmatprep.subr.bf16.mxu1 %v3294_v57 }
 0x4a2   : > { %2965 = vmatmul.mubr.msk.bf16.vlgmr.msra.gmra.mrb[4].mxu1 %vm692_vm0, %v3994_v5 }
 0x4a3   : > { %2989 = vmatpush3.bf16.msra.mxu1 %v3294_v57 }
 0x4a4   : > { %2990 = vmatprep.subr.bf16.mxu1 %v3295_v58 }
 0x4a7   : > { %2991 = vmatpush3.bf16.msra.mxu1 %v3295_v58 }
 0x4a8   : > { %2992 = vmatprep.subr.bf16.mxu1 %v3296_v59 }
 0x4ab   : > { %2993 = vmatpush3.bf16.msra.mxu1 %v3296_v59  ;;  %v3302_v59 = vld [vmem:[#allocation2 + $0x80] sm:$0xff]  }
 0x4ac   : > { %2994 = vmatprep.subr.bf16.mxu1 %v3297_v62 }
 0x4af   : > { %2995 = vmatpush3.bf16.msra.mxu1 %v3297_v62  ;;  %v3303_v62 = vld [vmem:[#allocation2 + $0x88] sm:$0xff]  }
 0x4b0   : > { %2996 = vmatprep.subr.bf16.mxu1 %v3298_v63 }
 0x4b3   : > { %2997 = vmatpush3.bf16.msra.mxu1 %v3298_v63  ;;  %v3304_v63 = vld [vmem:[#allocation2 + $0x90] sm:$0xff]  }
 0x4b4   : > { %2998 = vmatprep.subr.bf16.mxu1 %v3299_v0 }
 0x4b7   : > { %2999 = vmatpush3.bf16.msra.mxu1 %v3299_v0  ;;  %v3305_v0 = vld [vmem:[#allocation2 + $0x98] sm:$0xff]  }
 0x4b8   : > { %3000 = vmatprep.subr.bf16.mxu1 %v3300_v9 }
 0x4bb   : > { %3001 = vmatpush3.bf16.msra.mxu1 %v3300_v9 }
 0x4bc   : > { %3002 = vmatprep.subr.bf16.mxu1 %v3301_v10 }
 0x4bf   : > { %3003 = vmatpush3.bf16.msra.mxu1 %v3301_v10 }
 0x4c0   : > { %3016 = vmatprep.subr.bf16.mxu1 %v3302_v59 }
 0x575   : > { %v2966_v1 = vpop.f32.mrb[4].mxu1 }
 0x576   : > { %v1098_v3 = vpop.f32.mrb[5].mxu1 }
 0x577   : > { %v2967_v4 = vpop.f32.mrb[6].mxu1 }
 0x578   : > { %v1114_v6 = vpack.c.bf16 %v2967_v4, %v2966_v1  ;;  %v1101_v7 = vpop.f32.mrb[7].mxu1  ;;  %v3306_v1 = vld [vmem:[#allocation2 + $0xa0] sm:$0xff]   ;;  %v3308_v4 = vld [vmem:[#allocation2 + $0xb0] sm:$0xff]  }
 0x579   : > { %v1113_v8 = vpack.c.bf16 %v1101_v7, %v1098_v3  ;;  %v3307_v3 = vld [vmem:[#allocation2 + $0xa8] sm:$0xff]  }
 0x57b   : > { %2984 = vmatprep.mubr.bf16.mxu0 %v1113_v8 }
 0x57c   : > { %2985 = vmatmul.mubr.bf16.vlgmr.msra.gmra.mrb[8].mxu0 %v1114_v6 }
 0x57d   : > { %3012 = vmatprep.mubr.msk.bf16.mxu0 %vm692_vm0, %v3989_v2 }
 0x64f   : > { %v2986_v12 = vpop.f32.mrb[8].mxu0 }
 0x650   : > { %v1228_v13 = vadd.f32 %v2986_v12, %v2703_v11  ;;  %v1219_v14 = vpop.f32.mrb[9].mxu0 }
 0x651   : > { %v1220_v15 = vadd.f32 %v2703_v11, %v1219_v14  ;;  %v2987_v16 = vpop.f32.mrb[10].mxu0 }
 0x652   : > { %v1231_v17 = vadd.f32 %v2987_v16, %v2703_v11  ;;  %v1222_v18 = vpop.f32.mrb[11].mxu0  ;;  %v1236_v20 = vmax.f32 %v1228_v13, 0.0 }
 0x653   : > { %v1223_v19 = vadd.f32 %v2703_v11, %v1222_v18  ;;  %v1234_v21 = vmax.f32 %v1220_v15, 0.0 }
 0x654   : > { %v1237_v2 = vmax.f32 %v1231_v17, 0.0 }
 0x655   : > { %v1235_v22 = vmax.f32 %v1223_v19, 0.0  ;;  %v2721_v19 = vld [vmem:[#allocation8 + $0x1] ss:$0 sm:$0xff] }
 0x656   : > { %v1239_v23 = vpack.c.bf16 %v1237_v2, %v1236_v20 }
 0x657   : > { %v1238_v24 = vpack.c.bf16 %v1235_v22, %v1234_v21 }
 0x659   : > { %3004 = vmatprep.mubr.bf16.mxu1 %v1238_v24  ;;  %v2722_v24 = vld [vmem:[#allocation10 + $0x1] ss:$0 sm:$0xff] }
 0x65a   : > { %3005 = vmatmul.mubr.bf16.vlgmr.msra.gmra.mrb[8].mxu1 %v1239_v23 }
 0x65b   : > { %3017 = vmatpush3.bf16.msra.mxu1 %v3302_v59 }
 0x65c   : > { %3018 = vmatprep.subr.bf16.mxu1 %v3303_v62 }
 0x65f   : > { %3019 = vmatpush3.bf16.msra.mxu1 %v3303_v62 }
 0x660   : > { %3020 = vmatprep.subr.bf16.mxu1 %v3304_v63 }
 0x663   : > { %3021 = vmatpush3.bf16.msra.mxu1 %v3304_v63 }
 0x664   : > { %3022 = vmatprep.subr.bf16.mxu1 %v3305_v0 }
 0x667   : > { %3023 = vmatpush3.bf16.msra.mxu1 %v3305_v0 }
 0x668   : > { %3024 = vmatprep.subr.bf16.mxu1 %v3306_v1 }
 0x66b   : > { %3025 = vmatpush3.bf16.msra.mxu1 %v3306_v1 }
 0x66c   : > { %3026 = vmatprep.subr.bf16.mxu1 %v3307_v3 }
 0x66f   : > { %3027 = vmatpush3.bf16.msra.mxu1 %v3307_v3 }
 0x670   : > { %3028 = vmatprep.subr.bf16.mxu1 %v3308_v4 }
 0x673   : > { %3029 = vmatpush3.bf16.msra.mxu1 %v3308_v4 }
 0x72d   : > { %v3006_v26 = vpop.f32.mrb[8].mxu1 }
 0x72e   : > { %v1344_v27 = vpop.f32.mrb[9].mxu1  ;;  %v1353_v31 = vadd.f32 %v3006_v26, %v2712_v25 }
 0x72f   : > { %v1345_v28 = vadd.f32 %v2712_v25, %v1344_v27  ;;  %v3007_v29 = vpop.f32.mrb[10].mxu1 }
 0x730   : > { %v1347_v30 = vpop.f32.mrb[11].mxu1  ;;  %v1356_v34 = vadd.f32 %v3007_v29, %v2712_v25  ;;  %v1361_v36 = vmax.f32 %v1353_v31, 0.0 }
 0x731   : > { %v1359_v32 = vmax.f32 %v1345_v28, 0.0  ;;  %v1348_v33 = vadd.f32 %v2712_v25, %v1347_v30 }
 0x732   : > { %v1362_v37 = vmax.f32 %v1356_v34, 0.0 }
 0x733   : > { %v1360_v35 = vmax.f32 %v1348_v33, 0.0  ;;  %1363 = vadd.xlane.f32.xlu0 %v1359_v32 }
 0x735   : > { %1365 = vadd.xlane.f32.xlu1 %v1360_v35 }
 0x737   : > { %1367 = vadd.xlane.f32.xlu0 %v1361_v36 }
 0x739   : > { %1369 = vadd.xlane.f32.xlu1 %v1362_v37 }
 0x7c0   : > { %v1364_v38 = vpop.xlane.xlu0 %1363 }
 0x7c1   : > { %v1371_v39 = vmul.f32 0.013333334, %v1364_v38  ;;  %v3310_v38 = vld [vmem:[#allocation5 + $0x80] sm:$0xff]  }
 0x7c2   : > { %v1366_v40 = vpop.xlane.xlu1 %1365 }
 0x7c3   : > { %v1375_v41 = vsub.f32 %v1359_v32, %v1371_v39  ;;  %v1372_v42 = vmul.f32 0.013333334, %v1366_v40  ;;  %v3311_v39 = vld [vmem:[#allocation5 + $0x88] sm:$0xff]   ;;  %v3312_v40 = vld [vmem:[#allocation5 + $0x90] sm:$0xff]  }
 0x7c4   : > { %v1368_v43 = vpop.xlane.xlu0 %1367 }
 0x7c5   : > { %v1376_v44 = vsub.f32 %v1360_v35, %v1372_v42  ;;  %v1373_v45 = vmul.f32 0.013333334, %v1368_v43  ;;  %v1379_v46 = vmul.f32 %v4007_v61, %v1375_v41  ;;  %v3314_v42 = vld [vmem:[#allocation5 + $0xa0] sm:$0xff]   ;;  %v3315_v43 = vld [vmem:[#allocation5 + $0xa8] sm:$0xff]  }
 0x7c6   : > { %v1370_v47 = vpop.xlane.xlu1 %1369 }
 0x7c7   : > { %v1377_v48 = vsub.f32 %v1361_v36, %v1373_v45  ;;  %v1374_v49 = vmul.f32 0.013333334, %v1370_v47  ;;  %v1383_v50 = vmul.f32 %v1379_v46, %v1379_v46  ;;  %v1380_v51 = vmul.f32 %v4007_v61, %v1376_v44 }
 0x7c9   : > { %v1378_v52 = vsub.f32 %v1362_v37, %v1374_v49  ;;  %1387 = vadd.xlane.f32.xlu0 %v1383_v50  ;;  %v1384_v53 = vmul.f32 %v1380_v51, %v1380_v51  ;;  %v1381_v54 = vmul.f32 %v4007_v61, %v1377_v48  ;;  %v3309_v37 = vld [vmem:[#allocation2 + $0xb8] sm:$0xff]   ;;  %v3383_v49 = vld [vmem:[%s3986_s13] sm:$0xff]   ;;  %v3316_v50 = vld [vmem:[#allocation5 + $0xb0] sm:$0xff]  }
 0x7ca   : > { %3030 = vmatprep.subr.bf16.mxu1 %v3309_v37  ;;  %v3317_v51 = vld [vmem:[#allocation5 + $0xb8] sm:$0xff]  }
 0x7cb   : > { %1389 = vadd.xlane.f32.xlu1 %v1384_v53  ;;  %v1385_v56 = vmul.f32 %v1381_v54, %v1381_v54  ;;  %v1382_v57 = vmul.f32 %v4007_v61, %v1378_v52  ;;  %3031 = vmatpush3.bf16.msra.mxu1 %v3309_v37 }
 0x7cd   : > { %1391 = vadd.xlane.f32.xlu0 %v1385_v56  ;;  %v1386_v58 = vmul.f32 %v1382_v57, %v1382_v57 }
 0x7cf   : > { %1393 = vadd.xlane.f32.xlu1 %v1386_v58 }
 0x856   : > { %v1388_v6 = vpop.xlane.xlu0 %1387 }
 0x857   : > { %v1395_v7 = vmul.f32 0.013333334, %v1388_v6 }
 0x858   : > { %v1390_v8 = vpop.xlane.xlu1 %1389 }
 0x859   : > { %v1399_v9 = vadd.f32 1e-05, %v1395_v7  ;;  %v1396_v10 = vmul.f32 0.013333334, %v1390_v8  ;;  %v2734_v8 = vld [vmem:[#allocation7 + $0x2] ss:$0 sm:$0xff] }
 0x85a   : > { %v1392_v11 = vpop.xlane.xlu0 %1391 }
 0x85b   : > { %3359 = vrsqrt.f32 %v1399_v9  ;;  %v1400_v12 = vadd.f32 1e-05, %v1396_v10  ;;  %v1397_v13 = vmul.f32 0.013333334, %v1392_v11 }
 0x85c   : > { %v1394_v14 = vpop.xlane.xlu1 %1393 }
 0x85d   : > { %3361 = vrsqrt.f32 %v1400_v12  ;;  %v1401_v15 = vadd.f32 1e-05, %v1397_v13  ;;  %v1398_v16 = vmul.f32 0.013333334, %v1394_v14 }
 0x85f   : > { %3363 = vrsqrt.f32 %v1401_v15  ;;  %v1402_v17 = vadd.f32 1e-05, %v1398_v16 }
 0x861   : > { %3365 = vrsqrt.f32 %v1402_v17 }
 0x865   : > { %v3360_v18 = vpop.eup %3359 }
 0x866   : > { %v1407_v20 = vmul.f32 %v3360_v18, %v1375_v41  ;;  %v3313_v41 = vld [vmem:[#allocation5 + $0x98] sm:$0xff]  }
 0x867   : > { %v3362_v2 = vpop.eup %3361 }
 0x868   : > { %v1408_v21 = vmul.f32 %v3362_v2, %v1376_v44  ;;  %v1416_v22 = vmul.f32 %v2721_v19, %v1407_v20 }
 0x869   : > { %v3364_v23 = vpop.eup %3363 }
 0x86a   : > { %v1417_v25 = vmul.f32 %v2721_v19, %v1408_v21  ;;  %v1409_v26 = vmul.f32 %v3364_v23, %v1377_v48  ;;  %v1425_v28 = vadd.f32 %v2722_v24, %v1416_v22 }
 0x86b   : > { %v3366_v27 = vpop.eup %3365 }
 0x86c   : > { %v1426_v29 = vadd.f32 %v2722_v24, %v1417_v25  ;;  %v1410_v30 = vmul.f32 %v3366_v27, %v1378_v52  ;;  %v1418_v31 = vmul.f32 %v2721_v19, %v1409_v26  ;;  %v2725_v52 = vld [vmem:[%s4234_s5 + $0x2] ss:$0 sm:$0xff] }
 0x86e   : > { %v1429_v32 = vpack.c.bf16 %v1426_v29, %v1425_v28  ;;  %v1419_v33 = vmul.f32 %v2721_v19, %v1410_v30  ;;  %v1427_v34 = vadd.f32 %v2722_v24, %v1418_v31 }
 0x870   : > { %3008 = vmatprep.subr.bf16.mxu0 %v1429_v32  ;;  %v1428_v35 = vadd.f32 %v2722_v24, %v1419_v33 }
 0x871   : > { %3009 = vmatpush3.bf16.msra.mxu0 %v1429_v32 }
 0x872   : > { %v1430_v36 = vpack.c.bf16 %v1428_v35, %v1427_v34 }
 0x874   : > { %3010 = vmatprep.subr.bf16.mxu0 %v1430_v36 }
 0x875   : > { %3011 = vmatpush3.bf16.msra.mxu0 %v1430_v36 }
 0x876   : > { %3036 = vmatprep.subr.bf16.mxu0 %v3310_v38 }
 0x878   : > { %3013 = vmatmul.mubr.msk.bf16.vlgmr.msra.gmra.mrb[12].mxu0 %vm692_vm0, %v3994_v5 }
 0x879   : > { %3037 = vmatpush3.bf16.msra.mxu0 %v3310_v38 }
 0x87a   : > { %3038 = vmatprep.subr.bf16.mxu0 %v3311_v39 }
 0x87d   : > { %3039 = vmatpush3.bf16.msra.mxu0 %v3311_v39 }
 0x87e   : > { %3040 = vmatprep.subr.bf16.mxu0 %v3312_v40 }
 0x881   : > { %3041 = vmatpush3.bf16.msra.mxu0 %v3312_v40  ;;  %v3318_v40 = vld [vmem:[#allocation2 + $0xc0] sm:$0xff]  }
 0x882   : > { %3042 = vmatprep.subr.bf16.mxu0 %v3313_v41 }
 0x885   : > { %3043 = vmatpush3.bf16.msra.mxu0 %v3313_v41  ;;  %v3319_v41 = vld [vmem:[#allocation2 + $0xc8] sm:$0xff]  }
 0x886   : > { %3044 = vmatprep.subr.bf16.mxu0 %v3314_v42 }
 0x889   : > { %3045 = vmatpush3.bf16.msra.mxu0 %v3314_v42  ;;  %v3320_v42 = vld [vmem:[#allocation2 + $0xd0] sm:$0xff]  }
 0x88a   : > { %3046 = vmatprep.subr.bf16.mxu0 %v3315_v43 }
 0x88d   : > { %3047 = vmatpush3.bf16.msra.mxu0 %v3315_v43  ;;  %v3321_v43 = vld [vmem:[#allocation2 + $0xd8] sm:$0xff]  }
 0x88e   : > { %3048 = vmatprep.subr.bf16.mxu0 %v3316_v50 }
 0x891   : > { %3049 = vmatpush3.bf16.msra.mxu0 %v3316_v50 }
 0x892   : > { %3050 = vmatprep.subr.bf16.mxu0 %v3317_v51 }
 0x895   : > { %3051 = vmatpush3.bf16.msra.mxu0 %v3317_v51 }
 0x896   : > { %3064 = vmatprep.subr.bf16.mxu0 %v3318_v40 }
 0x94b   : > { %v3014_v5 = vpop.f32.mrb[12].mxu0 }
 0x94c   : > { %v1465_v44 = vpop.f32.mrb[13].mxu0 }
 0x94d   : > { %v3015_v45 = vpop.f32.mrb[14].mxu0 }
 0x94e   : > { %v1481_v46 = vpack.c.bf16 %v3015_v45, %v3014_v5  ;;  %v1468_v47 = vpop.f32.mrb[15].mxu0  ;;  %v3322_v5 = vld [vmem:[#allocation2 + $0xe0] sm:$0xff]  }
 0x94f   : > { %v1480_v48 = vpack.c.bf16 %v1468_v47, %v1465_v44  ;;  %v3323_v44 = vld [vmem:[#allocation2 + $0xe8] sm:$0xff]  }
 0x951   : > { %3032 = vmatprep.mubr.bf16.mxu1 %v1480_v48 }
 0x952   : > { %3033 = vmatmul.mubr.bf16.vlgmr.msra.gmra.mrb[12].mxu1 %v1481_v46 }
 0x953   : > { %3060 = vmatprep.mubr.msk.bf16.mxu1 %vm692_vm0, %v3383_v49 }
 0xa25   : > { %v3034_v53 = vpop.f32.mrb[12].mxu1 }
 0xa26   : > { %v1595_v54 = vadd.f32 %v3034_v53, %v2725_v52  ;;  %v1586_v56 = vpop.f32.mrb[13].mxu1 }
 0xa27   : > { %v1587_v57 = vadd.f32 %v2725_v52, %v1586_v56  ;;  %v3035_v58 = vpop.f32.mrb[14].mxu1 }
 0xa28   : > { %v1598_v59 = vadd.f32 %v3035_v58, %v2725_v52  ;;  %v1589_v62 = vpop.f32.mrb[15].mxu1  ;;  %v1603_v0 = vmax.f32 %v1595_v54, 0.0 }
 0xa29   : > { %v1590_v63 = vadd.f32 %v2725_v52, %v1589_v62  ;;  %v1601_v3 = vmax.f32 %v1587_v57, 0.0 }
 0xa2a   : > { %v1604_v1 = vmax.f32 %v1598_v59, 0.0  ;;  %v2743_v59 = vld [vmem:[#allocation8 + $0x2] ss:$0 sm:$0xff] }
 0xa2b   : > { %v1602_v4 = vmax.f32 %v1590_v63, 0.0 }
 0xa2c   : > { %v1606_v6 = vpack.c.bf16 %v1604_v1, %v1603_v0 }
 0xa2d   : > { %v1605_v7 = vpack.c.bf16 %v1602_v4, %v1601_v3  ;;  %v2744_v4 = vld [vmem:[#allocation10 + $0x2] ss:$0 sm:$0xff] }
 0xa2f   : > { %3052 = vmatprep.mubr.bf16.mxu0 %v1605_v7 }
 0xa30   : > { %3053 = vmatmul.mubr.bf16.vlgmr.msra.gmra.mrb[16].mxu0 %v1606_v6 }
 0xa31   : > { %3065 = vmatpush3.bf16.msra.mxu0 %v3318_v40 }
 0xa32   : > { %3066 = vmatprep.subr.bf16.mxu0 %v3319_v41 }
 0xa35   : > { %3067 = vmatpush3.bf16.msra.mxu0 %v3319_v41 }
 0xa36   : > { %3068 = vmatprep.subr.bf16.mxu0 %v3320_v42 }
 0xa39   : > { %3069 = vmatpush3.bf16.msra.mxu0 %v3320_v42 }
 0xa3a   : > { %3070 = vmatprep.subr.bf16.mxu0 %v3321_v43 }
 0xa3d   : > { %3071 = vmatpush3.bf16.msra.mxu0 %v3321_v43 }
 0xa3e   : > { %3072 = vmatprep.subr.bf16.mxu0 %v3322_v5 }
 0xa41   : > { %3073 = vmatpush3.bf16.msra.mxu0 %v3322_v5 }
 0xa42   : > { %3074 = vmatprep.subr.bf16.mxu0 %v3323_v44 }
 0xa45   : > { %3075 = vmatpush3.bf16.msra.mxu0 %v3323_v44 }
 0xb03   : > { %v3054_v9 = vpop.f32.mrb[16].mxu0 }
 0xb04   : > { %v1711_v10 = vpop.f32.mrb[17].mxu0  ;;  %v1720_v14 = vadd.f32 %v3054_v9, %v2734_v8 }
 0xb05   : > { %v1712_v11 = vadd.f32 %v2734_v8, %v1711_v10  ;;  %v3055_v12 = vpop.f32.mrb[18].mxu0 }
 0xb06   : > { %v1714_v13 = vpop.f32.mrb[19].mxu0  ;;  %v1723_v17 = vadd.f32 %v3055_v12, %v2734_v8  ;;  %v1728_v19 = vmax.f32 %v1720_v14, 0.0 }
 0xb07   : > { %v1726_v15 = vmax.f32 %v1712_v11, 0.0  ;;  %v1715_v16 = vadd.f32 %v2734_v8, %v1714_v13 }
 0xb08   : > { %v1729_v20 = vmax.f32 %v1723_v17, 0.0 }
 0xb09   : > { %v1727_v18 = vmax.f32 %v1715_v16, 0.0  ;;  %1730 = vadd.xlane.f32.xlu0 %v1726_v15 }
 0xb0b   : > { %1732 = vadd.xlane.f32.xlu1 %v1727_v18 }
 0xb0d   : > { %1734 = vadd.xlane.f32.xlu0 %v1728_v19 }
 0xb0f   : > { %1736 = vadd.xlane.f32.xlu1 %v1729_v20 }
 0xb96   : > { %v1731_v2 = vpop.xlane.xlu0 %1730 }
 0xb97   : > { %v1738_v21 = vmul.f32 0.013333334, %v1731_v2  ;;  %v3327_v2 = vld [vmem:[#allocation5 + $0xc8] sm:$0xff]  }
 0xb98   : > { %v1733_v22 = vpop.xlane.xlu1 %1732 }
 0xb99   : > { %v1742_v23 = vsub.f32 %v1726_v15, %v1738_v21  ;;  %v1739_v24 = vmul.f32 0.013333334, %v1733_v22  ;;  %v3328_v21 = vld [vmem:[#allocation5 + $0xd0] sm:$0xff]   ;;  %v3329_v22 = vld [vmem:[#allocation5 + $0xd8] sm:$0xff]  }
 0xb9a   : > { %v1735_v25 = vpop.xlane.xlu0 %1734 }
 0xb9b   : > { %v1743_v26 = vsub.f32 %v1727_v18, %v1739_v24  ;;  %v1740_v27 = vmul.f32 0.013333334, %v1735_v25  ;;  %v1746_v28 = vmul.f32 %v4007_v61, %v1742_v23  ;;  %v3384_v18 = vld [vmem:[%s3986_s13 + $0x8] sm:$0xff]   ;;  %s3553_s13 = scalar_lea.vmem %s4135_s29, 512 }
 0xb9c   : > { %v1737_v29 = vpop.xlane.xlu1 %1736  ;;  %v3331_v24 = vld [vmem:[#allocation5 + $0xe8] sm:$0xff]   ;;  %p3554_p1 = scmp.ne.s32.totalorder %s4135_s29, %s3553_s13 }
 0xb9d   : > { %v1744_v30 = vsub.f32 %v1728_v19, %v1740_v27  ;;  %v1741_v31 = vmul.f32 0.013333334, %v1737_v29  ;;  %v1750_v32 = vmul.f32 %v1746_v28, %v1746_v28  ;;  %v1747_v33 = vmul.f32 %v4007_v61, %v1743_v26  ;;  %v3325_v19 = vld [vmem:[#allocation2 + $0xf8] sm:$0xff]  }
 0xb9e   : > { %p3555_p9 = pnand %p3554_p1, %p4289_p6 }
 0xb9f   : > { %v1745_v34 = vsub.f32 %v1729_v20, %v1741_v31  ;;  %1754 = vadd.xlane.f32.xlu0 %v1750_v32  ;;  %v1751_v35 = vmul.f32 %v1747_v33, %v1747_v33  ;;  %v1748_v36 = vmul.f32 %v4007_v61, %v1744_v30  ;;  %v3326_v20 = vld [vmem:[#allocation5 + $0xc0] sm:$0xff]   ;;  %v3332_v31 = vld [vmem:[#allocation5 + $0xf0] sm:$0xff]   ;;  %v3333_v32 = vld [vmem:[#allocation5 + $0xf8] sm:$0xff]  }
 0xba0   : > { %v2747_v33 = vld [vmem:[%s4234_s5 + $0x3] ss:$0 sm:$0xff]  ;;  %p3556_p5 = pneg %p3555_p9 }
 0xba1   : > { %1756 = vadd.xlane.f32.xlu1 %v1751_v35  ;;  %v1752_v37 = vmul.f32 %v1748_v36, %v1748_v36  ;;  %v1749_v38 = vmul.f32 %v4007_v61, %v1745_v34  ;;  %v3324_v61 = vld [vmem:[#allocation2 + $0xf0] sm:$0xff]  }
 0xba2   : > { %3076 = vmatprep.subr.bf16.mxu0 %v3324_v61 }
 0xba3   : > { %1758 = vadd.xlane.f32.xlu0 %v1752_v37  ;;  %v1753_v39 = vmul.f32 %v1749_v38, %v1749_v38  ;;  %3077 = vmatpush3.bf16.msra.mxu0 %v3324_v61 }
 0xba4   : > { %3078 = vmatprep.subr.bf16.mxu0 %v3325_v19 }
 0xba5   : > { %1760 = vadd.xlane.f32.xlu1 %v1753_v39 }
 0xba7   : > { %3079 = vmatpush3.bf16.msra.mxu0 %v3325_v19  ;;  %v3348_v19 = vld [vmem:[#allocation11 + $0x28] sm:$0xff]  }
 0xba8   : > { %3104 = vmatprep.subr.bf16.mxu0 %v3673_v60 }
 0xc2c   : > { %v1755_v45 = vpop.xlane.xlu0 %1754 }
 0xc2d   : > { %v1762_v46 = vmul.f32 0.013333334, %v1755_v45 }
 0xc2e   : > { %v1757_v47 = vpop.xlane.xlu1 %1756 }
 0xc2f   : > { %v1766_v48 = vadd.f32 1e-05, %v1762_v46  ;;  %v1763_v49 = vmul.f32 0.013333334, %v1757_v47  ;;  %v3335_v46 = vld [vmem:[%s4239_s10] sm:$0xff]   ;;  %v3675_v47 = vmov 0  }
 0xc30   : > { %v1759_v50 = vpop.xlane.xlu0 %1758  ;;  %3264 = vset.pattern.permute.xlu0 %v3675_v47  ;;  %3265 = vset.pattern.permute.xlu1 %v3675_v47 }
 0xc31   : > { %3367 = vrsqrt.f32 %v1766_v48  ;;  %v1767_v51 = vadd.f32 1e-05, %v1763_v49  ;;  %v1764_v52 = vmul.f32 0.013333334, %v1759_v50  ;;  %v2154_v48 = vld [vmem:[%s652_s6] sm:$0xff]  ;;  %v2155_v49 = vld [vmem:[%s652_s6 + $0x8] sm:$0xff] }
 0xc32   : > { %v1761_v53 = vpop.xlane.xlu1 %1760  ;;  %v3336_v50 = vld [vmem:[%s4239_s10 + $0x8] sm:$0xff]   ;;  %2158 = vperm.xlu0 %3264, %v2154_v48   ;;  %2163 = vperm.xlu1 %3265, %v2155_v49   ;;  %s3676_s6 = smov [#allocation13]  }
 0xc33   : > { %3369 = vrsqrt.f32 %v1767_v51  ;;  %v1768_v54 = vadd.f32 1e-05, %v1764_v52  ;;  %v1765_v56 = vmul.f32 0.013333334, %v1761_v53  ;;  %v3337_v51 = vld [vmem:[%s4239_s10 + $0x10] sm:$0xff]   ;;  %v3338_v52 = vld [vmem:[%s4239_s10 + $0x18] sm:$0xff]  }
 0xc34   : > { %v3339_v53 = vld [vmem:[%s4239_s10 + $0x20] sm:$0xff]  }
 0xc35   : > { %3371 = vrsqrt.f32 %v1768_v54  ;;  %v1769_v57 = vadd.f32 1e-05, %v1765_v56  ;;  %v3340_v54 = vld [vmem:[%s4239_s10 + $0x28] sm:$0xff]   ;;  %v2756_v56 = vld [vmem:[#allocation7 + $0x3] ss:$0 sm:$0xff] }
 0xc37   : > { %3373 = vrsqrt.f32 %v1769_v57 }
 0xc3b   : > { %v3368_v58 = vpop.eup %3367 }
 0xc3c   : > { %v1774_v62 = vmul.f32 %v3368_v58, %v1742_v23  ;;  %v3330_v23 = vld [vmem:[#allocation5 + $0xe0] sm:$0xff]  }
 0xc3d   : > { %v3370_v63 = vpop.eup %3369 }
 0xc3e   : > { %v1775_v0 = vmul.f32 %v3370_v63, %v1743_v26  ;;  %v1783_v1 = vmul.f32 %v2743_v59, %v1774_v62 }
 0xc3f   : > { %v3372_v3 = vpop.eup %3371 }
 0xc40   : > { %v1784_v6 = vmul.f32 %v2743_v59, %v1775_v0  ;;  %v1776_v7 = vmul.f32 %v3372_v3, %v1744_v30  ;;  %v1792_v9 = vadd.f32 %v2744_v4, %v1783_v1 }
 0xc41   : > { %v3374_v8 = vpop.eup %3373 }
 0xc42   : > { %v1793_v10 = vadd.f32 %v2744_v4, %v1784_v6  ;;  %v1777_v11 = vmul.f32 %v3374_v8, %v1745_v34  ;;  %v1785_v12 = vmul.f32 %v2743_v59, %v1776_v7 }
 0xc44   : > { %v1796_v13 = vpack.c.bf16 %v1793_v10, %v1792_v9  ;;  %v1786_v14 = vmul.f32 %v2743_v59, %v1777_v11  ;;  %v1794_v15 = vadd.f32 %v2744_v4, %v1785_v12  ;;  %v3334_v11 = vld [vmem:[%s4056_s23] sm:$0xff]   ;;  %v3341_v12 = vld [vmem:[%s4239_s10 + $0x30] sm:$0xff]   ;;  %s3557_s23 = sshll.u32 %s3676_s6, 4  ;;  %s3558_s23 = int_to_ptr.vmem [resolvable:$false] %s3557_s23 }
 0xc45   : > { %p3560_p0 = scmp.lt.s32.totalorder %s4135_s29, %s3558_s23 }
 0xc46   : > { %3056 = vmatprep.subr.bf16.mxu1 %v1796_v13  ;;  %v1795_v16 = vadd.f32 %v2744_v4, %v1786_v14  ;;  %v3343_v14 = vld [vmem:[#allocation11] sm:$0xff]  }
 0xc47   : > { %3057 = vmatpush3.bf16.msra.mxu1 %v1796_v13  ;;  %v3342_v13 = vld [vmem:[%s4239_s10 + $0x38] sm:$0xff]  }
 0xc48   : > { %v1797_v17 = vpack.c.bf16 %v1795_v16, %v1794_v15  ;;  %v3344_v15 = vld [vmem:[#allocation11 + $0x8] sm:$0xff]   ;;  %v3345_v16 = vld [vmem:[#allocation11 + $0x10] sm:$0xff]  }
 0xc4a   : > { %3058 = vmatprep.subr.bf16.mxu1 %v1797_v17 }
 0xc4b   : > { %3059 = vmatpush3.bf16.msra.mxu1 %v1797_v17  ;;  %v3346_v17 = vld [vmem:[#allocation11 + $0x18] sm:$0xff]  }
 0xc4c   : > { %3084 = vmatprep.subr.bf16.mxu1 %v3326_v20 }
 0xc4e   : > { %3061 = vmatmul.mubr.msk.bf16.vlgmr.msra.gmra.mrb[16].mxu1 %vm692_vm0, %v3384_v18  ;;  %v3347_v18 = vld [vmem:[#allocation11 + $0x20] sm:$0xff]  }
 0xc4f   : > { %3085 = vmatpush3.bf16.msra.mxu1 %v3326_v20 }
 0xc50   : > { %3086 = vmatprep.subr.bf16.mxu1 %v3327_v2 }
 0xc53   : > { %3087 = vmatpush3.bf16.msra.mxu1 %v3327_v2 }
 0xc54   : > { %3088 = vmatprep.subr.bf16.mxu1 %v3328_v21 }
 0xc57   : > { %3089 = vmatpush3.bf16.msra.mxu1 %v3328_v21 }
 0xc58   : > { %3090 = vmatprep.subr.bf16.mxu1 %v3329_v22 }
 0xc5b   : > { %3091 = vmatpush3.bf16.msra.mxu1 %v3329_v22 }
 0xc5c   : > { %3092 = vmatprep.subr.bf16.mxu1 %v3330_v23 }
 0xc5f   : > { %3093 = vmatpush3.bf16.msra.mxu1 %v3330_v23 }
 0xc60   : > { %3094 = vmatprep.subr.bf16.mxu1 %v3331_v24 }
 0xc63   : > { %3095 = vmatpush3.bf16.msra.mxu1 %v3331_v24 }
 0xc64   : > { %3096 = vmatprep.subr.bf16.mxu1 %v3332_v31 }
 0xc67   : > { %3097 = vmatpush3.bf16.msra.mxu1 %v3332_v31 }
 0xc68   : > { %3098 = vmatprep.subr.bf16.mxu1 %v3333_v32 }
 0xc6b   : > { %3099 = vmatpush3.bf16.msra.mxu1 %v3333_v32 }
 0xc6c   : > { %3112 = vmatprep.subr.bf16.mxu1 %v3673_v60 }
 0xcb1   : > { %v2159_v20 = vpop.permute.xlu0 %2158  ;;  %v2164_v21 = vpop.permute.xlu1 %2163 }
 0xd21   : > { %v3062_v25 = vpop.f32.mrb[16].mxu1 }
 0xd22   : > { %v1832_v26 = vpop.f32.mrb[17].mxu1 }
 0xd23   : > { %v3063_v27 = vpop.f32.mrb[18].mxu1 }
 0xd24   : > { %v1848_v28 = vpack.c.bf16 %v3063_v27, %v3062_v25  ;;  %v1835_v29 = vpop.f32.mrb[19].mxu1 }
 0xd25   : > { %v1847_v30 = vpack.c.bf16 %v1835_v29, %v1832_v26  ;;  %v3350_v29 = vld [vmem:[#allocation11 + $0x38] sm:$0xff]  }
 0xd27   : > { %3080 = vmatprep.mubr.bf16.mxu0 %v1847_v30  ;;  %v2767_v30 = vld [vmem:[%s4285_s16] ss:$0 sm:$0xff] }
 0xd28   : > { %3081 = vmatmul.mubr.bf16.vlgmr.msra.gmra.mrb[20].mxu0 %v1848_v28  ;;  %v3349_v28 = vld [vmem:[#allocation11 + $0x30] sm:$0xff]  }
 0xd29   : > { %3108 = vmatprep.mubr.msk.bf16.mxu0 %vm3674_vm2, %v3673_v60 }
 0xdfb   : > { %v3082_v34 = vpop.f32.mrb[20].mxu0 }
 0xdfc   : > { %v1962_v35 = vadd.f32 %v3082_v34, %v2747_v33  ;;  %v1953_v36 = vpop.f32.mrb[21].mxu0 }
 0xdfd   : > { %v1954_v37 = vadd.f32 %v2747_v33, %v1953_v36  ;;  %v3083_v38 = vpop.f32.mrb[22].mxu0 }
 0xdfe   : > { %v1965_v39 = vadd.f32 %v3083_v38, %v2747_v33  ;;  %v1956_v40 = vpop.f32.mrb[23].mxu0  ;;  %v1970_v42 = vmax.f32 %v1962_v35, 0.0  ;;  %v2776_v38 = vld [vmem:[%s4286_s21] ss:$0 sm:$0xff] }
 0xdff   : > { %v1957_v41 = vadd.f32 %v2747_v33, %v1956_v40  ;;  %v1968_v5 = vmax.f32 %v1954_v37, 0.0 }
 0xe00   : > { %v1971_v43 = vmax.f32 %v1965_v39, 0.0 }
 0xe01   : > { %v1969_v44 = vmax.f32 %v1957_v41, 0.0 }
 0xe02   : > { %v1973_v61 = vpack.c.bf16 %v1971_v43, %v1970_v42 }
 0xe03   : > { %v1972_v45 = vpack.c.bf16 %v1969_v44, %v1968_v5 }
 0xe05   : > { %3100 = vmatprep.mubr.bf16.mxu1 %v1972_v45 }
 0xe06   : > { %3101 = vmatmul.mubr.bf16.vlgmr.msra.gmra.mrb[20].mxu1 %v1973_v61 }
 0xe07   : > { %3128 = vmatprep.mubr.msk.bf16.mxu1 %vm3674_vm2, %v3673_v60  ;;  %3113 = vmatpush3.bf16.msra.mxu1 %v3335_v46 }
 0xe08   : > { %3114 = vmatprep.subr.bf16.mxu1 %v3673_v60 }
 0xe0b   : > { %3115 = vmatpush3.bf16.msra.mxu1 %v3336_v50 }
 0xe0c   : > { %3116 = vmatprep.subr.bf16.mxu1 %v3673_v60 }
 0xe0f   : > { %3117 = vmatpush3.bf16.msra.mxu1 %v3337_v51 }
 0xe10   : > { %3118 = vmatprep.subr.bf16.mxu1 %v3673_v60 }
 0xe13   : > { %3119 = vmatpush3.bf16.msra.mxu1 %v3338_v52 }
 0xe14   : > { %3120 = vmatprep.subr.bf16.mxu1 %v3673_v60 }
 0xe17   : > { %3121 = vmatpush3.bf16.msra.mxu1 %v3339_v53 }
 0xe18   : > { %3122 = vmatprep.subr.bf16.mxu1 %v3673_v60 }
 0xe1b   : > { %3123 = vmatpush3.bf16.msra.mxu1 %v3340_v54 }
 0xe1c   : > { %3124 = vmatprep.subr.bf16.mxu1 %v3673_v60 }
 0xe1f   : > { %3125 = vmatpush3.bf16.msra.mxu1 %v3341_v12 }
 0xe20   : > { %3126 = vmatprep.subr.bf16.mxu1 %v3673_v60 }
 0xe23   : > { %3127 = vmatpush3.bf16.msra.mxu1 %v3342_v13 }
 0xed9   : > { %v3102_v57 = vpop.f32.mrb[20].mxu1 }
 0xeda   : > { %v2087_v58 = vadd.f32 %v3102_v57, %v2756_v56  ;;  %v2078_v59 = vpop.f32.mrb[21].mxu1 }
 0xedb   : > { %v2079_v62 = vadd.f32 %v2756_v56, %v2078_v59  ;;  %v3103_v63 = vpop.f32.mrb[22].mxu1 }
 0xedc   : > { %2101 = vst [vmem:[%s4091_s18 + $0x10] sm:$0xff] %v2087_v58  ;;  %v2090_v0 = vadd.f32 %v3103_v63, %v2756_v56  ;;  %v2081_v1 = vpop.f32.mrb[23].mxu1  ;;  %v2095_v4 = vmax.f32 %v2087_v58, 0.0 }
 0xedd   : > { %2099 = vst [vmem:[%s4091_s18] sm:$0xff] %v2079_v62  ;;  %v2082_v3 = vadd.f32 %v2756_v56, %v2081_v1  ;;  %v2093_v7 = vmax.f32 %v2079_v62, 0.0 }
 0xede   : > { %v2096_v6 = vmax.f32 %v2090_v0, 0.0  ;;  %2102 = vst [vmem:[%s4091_s18 + $0x18] sm:$0xff] %v2090_v0 }
 0xedf   : > { %v2094_v8 = vmax.f32 %v2082_v3, 0.0  ;;  %2100 = vst [vmem:[%s4091_s18 + $0x8] sm:$0xff] %v2082_v3  ;;  %s3559_s18 = scalar_lea.vmem %s3558_s23, 1024 }
 0xee0   : > { %v2098_v9 = vpack.c.bf16 %v2096_v6, %v2095_v4  ;;  %p3561_p10 = scmp.lt.s32.totalorder %s3559_s18, %s3553_s13 }
 0xee1   : > { %v2097_v10 = vpack.c.bf16 %v2094_v8, %v2093_v7 }
 0xee2   : > { %p3562_p2 = por %p3561_p10, %p3560_p0 }
 0xee3   : > { %3105 = vmatpush3.bf16.msra.mxu0 %v2097_v10 }
 0xee4   : > { %3106 = vmatprep.subr.bf16.mxu0 %v3673_v60  ;;  %p3563_p3 = pnand %p3562_p2, %p3556_p5 }
 0xee7   : > { %3107 = vmatpush3.bf16.msra.mxu0 %v2098_v9 }
 0xee8   : > { %3132 = vmatprep.subr.bf16.mxu0 %v3673_v60 }
 0xeea   : > { %3109 = vmatmul.mubr.msk.bf16.vlgmr.msra.gmra.mrb[24].mxu0 %vm692_vm0, %v3334_v11 }
 0xeeb   : > { %3148 = vmatprep.mubr.msk.bf16.mxu0 %vm3674_vm2, %v3673_v60  ;;  %3133 = vmatpush3.bf16.msra.mxu0 %v3343_v14 }
 0xeec   : > { %3134 = vmatprep.subr.bf16.mxu0 %v3673_v60 }
 0xeef   : > { %3135 = vmatpush3.bf16.msra.mxu0 %v3344_v15 }
 0xef0   : > { %3136 = vmatprep.subr.bf16.mxu0 %v3673_v60 }
 0xef3   : > { %3137 = vmatpush3.bf16.msra.mxu0 %v3345_v16 }
 0xef4   : > { %3138 = vmatprep.subr.bf16.mxu0 %v3673_v60 }
 0xef7   : > { %3139 = vmatpush3.bf16.msra.mxu0 %v3346_v17 }
 0xef8   : > { %3140 = vmatprep.subr.bf16.mxu0 %v3673_v60 }
 0xefb   : > { %3141 = vmatpush3.bf16.msra.mxu0 %v3347_v18 }
 0xefc   : > { %3142 = vmatprep.subr.bf16.mxu0 %v3673_v60 }
 0xeff   : > { %3143 = vmatpush3.bf16.msra.mxu0 %v3348_v19 }
 0xf00   : > { %3144 = vmatprep.subr.bf16.mxu0 %v3673_v60 }
 0xf03   : > { %3145 = vmatpush3.bf16.msra.mxu0 %v3349_v28 }
 0xf04   : > { %3146 = vmatprep.subr.bf16.mxu0 %v3673_v60 }
 0xf07   : > { %3147 = vmatpush3.bf16.msra.mxu0 %v3350_v29 }
 0xfbd   : > { %v2147_v2 = vpop.f32.mrb[24].mxu0 }
 0xfbe   : > { %v3110_v22 = vpop.f32.mrb[25].mxu0  ;;  %v2166_v24 = vmul.f32 %v2159_v20, %v2147_v2 }
 0xfbf   : > { %v2150_v23 = vpop.f32.mrb[26].mxu0 }
 0xfc0   : > { %v2167_v25 = vmul.f32 %v2164_v21, %v2150_v23  ;;  %v3111_v26 = vpop.f32.mrb[27].mxu0 }
 0xfc2   : > { %v2168_v27 = vpack.c.bf16 %v2167_v25, %v2166_v24 }
 0xfc4   : > { %3129 = vmatmul.mubr.bf16.vlgmr.msra.gmra.mrb[24].mxu1 %v2168_v27 }
0x1097   : > { %v2274_v31 = vpop.f32.mrb[24].mxu1 }
0x1098   : > { %v3130_v32 = vpop.f32.mrb[25].mxu1  ;;  %v2275_v34 = vadd.f32 %v2767_v30, %v2274_v31 }
0x1099   : > { %v2277_v33 = vpop.f32.mrb[26].mxu1 }
0x109a   : > { %v2278_v35 = vadd.f32 %v2767_v30, %v2277_v33  ;;  %v3131_v36 = vpop.f32.mrb[27].mxu1 }
0x109c   : > { %v2281_v37 = vpack.c.bf16 %v2278_v35, %v2275_v34 }
0x109e   : > { %3149 = vmatmul.mubr.bf16.vlgmr.msra.gmra.mrb[28].mxu0 %v2281_v37 }
0x1171   : > { %v2387_v39 = vpop.f32.mrb[28].mxu0 }
0x1172   : > { %v4124_v60 = vadd.f32 %v2776_v38, %v2387_v39  ;;  %v3150_v40 = vpop.f32.mrb[29].mxu0 }
0x1173   : > { %v2390_v41 = vpop.f32.mrb[30].mxu0 }
0x1174   : > { %v4126_v42 = vadd.f32 %v2776_v38, %v2390_v41  ;;  %v3151_v43 = vpop.f32.mrb[31].mxu0  ;;  %v2395_v5 = vsel %vm2394_vm3, %v4124_v60, -1e+30 }
0x1175   : > { %2397 = vmax.xlane.f32.xlu1 %v2395_v5 }
0x1176   : > { %v2396_v44 = vsel %vm2394_vm3, %v4126_v42, -1e+30 }
0x1177   : > { %2399 = vmax.xlane.f32.xlu0 %v2396_v44 }
0x1202   : > { %v2398_v61 = vpop.xlane.xlu1 %2397 }
0x1203   : > { %v2401_v45 = vsub.f32 %v2395_v5, %v2398_v61 }
0x1204   : > { %v2400_v46 = vpop.xlane.xlu0 %2399 }
0x1205   : > { %v2403_v47 = vmul.f32 1.442695, %v2401_v45  ;;  %v2402_v48 = vsub.f32 %v2396_v44, %v2400_v46 }
0x1207   : > { %3375 = vpow2.f32 %v2403_v47  ;;  %v2405_v49 = vmul.f32 1.442695, %v2402_v48 }
0x1209   : > { %3377 = vpow2.f32 %v2405_v49 }
0x1211   : > { %v3376_v50 = vpop.eup %3375 }
0x1212   : > { %2407 = vadd.xlane.f32.xlu1 %v3376_v50 }
0x1213   : > { %v3378_v51 = vpop.eup %3377 }
0x1216   : > { %2409 = vadd.xlane.f32.xlu1 %v3378_v51 }
0x1217   : > { %3566 = shalt.err (!%p3563_p3)
}
0x1218   : > { %s3567_s28 = scalar_lea.hbm %s4141_s20, 512  ;;  %s3571_s27 = scalar_lea.hbm %s4288_s24, 1024 }
0x1219   : > { %p3568_p4 = scmp.ne.s32.totalorder %s4141_s20, %s3567_s28  ;;  %p3572_p8 = scmp.lt.u32.totalorder %s4141_s20, %s4288_s24 }
0x121a   : > { %p3573_p11 = scmp.lt.u32.totalorder %s3571_s27, %s3567_s28  ;;  %p3575_p1 = scmp.lt.u32.totalorder %s3567_s28, %s4141_s20 }
0x121b   : > { %p3569_p12 = pnand %p3568_p4, %p4289_p6 }
0x121c   : > { %p3574_p13 = por %p3573_p11, %p3572_p8 }
0x121d   : > { %p3570_p7 = pneg %p3569_p12 }
0x121e   : > { %p3576_p9 = por %p3575_p1, %p3574_p13 }
0x1220   : > { %p3577_p5 = pnand %p3576_p9, %p3570_p7 }
0x1222   : > { %3580 = shalt.err (!%p3577_p5)
}
0x1223   : > { %s3677_s14 = smov 128   ;;  %s3678_s15 = smov 8  }
0x1224   : > { %3176 = dma.vmem_to_hbm [thread:$0]  (%p4289_p6), %s4135_s29, 512, %s4141_s20, %s2424_s11, %s3677_s14, %s3677_s14, %s3678_s15  }
0x1225   : > { %s2665_s13 = sshll.u32 %s4088_s30, 4  ;;  %s2794_s6 = sshll.u32 %s3781_s22, 8 }
0x1226   : > { %s629_s29 = scalar_lea.vmem [#allocation14], %s2665_s13  ;;  %s4290_s18 = sld [smem:[#allocation33_spill]] }
0x1227   : > { %s2458_s20 = sshll.u32 %s629_s29, 4  ;;  %s2429_s22 = scalar_lea.sflag [#allocation15], %s4088_s30  ;;  %s4181_s20 = int_to_ptr.vmem [resolvable:$true] %s2458_s20 }
0x1228   : > { %s3581_s25 = scalar_lea.vmem %s4181_s20, 256  ;;  %s3679_s27 = smov [#allocation14]  }
0x1229   : > { %p3582_p0 = scmp.ne.s32.totalorder %s4181_s20, %s3581_s25  ;;  %s3585_s21 = sshll.u32 %s3679_s27, 4  ;;  %s3586_s21 = int_to_ptr.vmem [resolvable:$false] %s3585_s21 }
0x122a   : > { %s3587_s26 = scalar_lea.vmem %s3586_s21, 512  ;;  %p3588_p3 = scmp.lt.s32.totalorder %s4181_s20, %s3586_s21 }
0x122b   : > { %p3583_p10 = pnand %p3582_p0, %p4289_p6  ;;  %p3589_p4 = scmp.lt.s32.totalorder %s3587_s26, %s3581_s25 }
0x122c   : > { %s4291_s28 = smov %s4290_s18  ;;  %s4179_s16 = scalar_lea.hbm %s4290_s18, %s2794_s6 }
0x122d   : > { %p3584_p2 = pneg %p3583_p10  ;;  %p3590_p12 = por %p3589_p4, %p3588_p3 }
0x122f   : > { %p3591_p7 = pnand %p3590_p12, %p3584_p2 }
0x129f   : > { %v2408_v52 = vpop.xlane.xlu1 %2407 }
0x12a0   : > { %3379 = vlog2.f32 %v2408_v52 }
0x12a3   : > { %v2410_v53 = vpop.xlane.xlu1 %2409 }
0x12a4   : > { %3381 = vlog2.f32 %v2410_v53 }
0x12aa   : > { %v3380_v54 = vpop.eup %3379 }
0x12ab   : > { %v2412_v56 = vmul.f32 0.6931472, %v3380_v54 }
0x12ad   : > { %v2415_v57 = vadd.f32 %v2412_v56, %v2398_v61 }
0x12ae   : > { %v3382_v58 = vpop.eup %3381 }
0x12af   : > { %v2417_v59 = vsub.f32 %v4124_v60, %v2415_v57  ;;  %v2414_v62 = vmul.f32 0.6931472, %v3382_v58 }
0x12b1   : > { %v2419_v63 = vsel %vm2394_vm3, %v2417_v59, 0.0  ;;  %v2416_v0 = vadd.f32 %v2414_v62, %v2400_v46 }
0x12b2   : > { %2421 = vst [vmem:[%s629_s29] sm:$0xff] %v2419_v63 }
0x12b3   : > { %v2418_v1 = vsub.f32 %v4126_v42, %v2416_v0 }
0x12b5   : > { %v2420_v3 = vsel %vm2394_vm3, %v2418_v1, 0.0 }
0x12b6   : > { %2422 = vst [vmem:[%s629_s29 + $0x8] sm:$0xff] %v2420_v3 }
0x12b7   : > { %3594 = shalt.err (!%p3591_p7)
}
0x12b8   : > { %s3595_s13 = scalar_lea.hbm %s4179_s16, 256  ;;  %s3599_s11 = scalar_lea.hbm %s4291_s28, 512 }
0x12b9   : > { %p3596_p8 = scmp.ne.s32.totalorder %s4179_s16, %s3595_s13  ;;  %p3600_p1 = scmp.lt.u32.totalorder %s4179_s16, %s4291_s28 }
0x12ba   : > { %p3601_p9 = scmp.lt.u32.totalorder %s3599_s11, %s3595_s13  ;;  %p3603_p0 = scmp.lt.u32.totalorder %s3595_s13, %s4179_s16 }
0x12bb   : > { %p3597_p11 = pnand %p3596_p8, %p4289_p6 }
0x12bc   : > { %p3602_p5 = por %p3601_p9, %p3600_p1 }
0x12bd   : > { %p3598_p13 = pneg %p3597_p11 }
0x12be   : > { %p3604_p10 = por %p3603_p0, %p3602_p5 }
0x12c0   : > { %p3605_p2 = pnand %p3604_p10, %p3598_p13 }
0x12c2   : > { %3608 = shalt.err (!%p3605_p2)
}
0x12c3   : > { %3177 = dma.vmem_to_hbm [thread:$0]  (%p4289_p6), %s4181_s20, 256, %s4179_s16, %s2429_s22, %s3677_s14, %s3677_s14, %s3678_s15  }
0x12c4 PF: > { %s4292_s25 = sld [smem:[#allocation24_spill]]  ;;  %s4293_s27 = sld [smem:[#allocation22_spill]] }
0x12c5   : > { %s4294_s21 = sld [smem:[#allocation28_spill]] }
0x12ca   : > { %p3218_p3 = scmp.ge.s32.totalorder %s4292_s25, 2  ;;  %s2473_s26 = sand.u32 1, %s4293_s27  }
0x12cb   : > { %p4295_p4 = scmp.ne.s32.totalorder %s4294_s21, 0  ;;  %s2474_s13 = scalar_lea.sflag [#allocation4], %s2473_s26 }
0x12cd   : > { %p3200_p12 = pnand %p3218_p3, %p4295_p4 }
0x12cf   : > { %3642 = dma.done.wait (!%p3200_p12), %s2474_s13, 512  }
0x12d0   : > { %3644 = vsyncadd (!%p3200_p12), %s2474_s13, 4294966784  ;;  %s2483_s17 = scalar_lea.sflag [#allocation15], %s2473_s26 }
0x12d1   : > { %3646 = dma.done.wait (!%p3200_p12), %s2483_s17, 256  }
0x12d2   : > { %3648 = vsyncadd (!%p3200_p12), %s2483_s17, 4294967040  ;;  %s4296_s21 = sld [smem:[#allocation25_spill]]  ;;  %s4297_s30 = sld [smem:[#allocation23_spill]] }
0x12d3   : > { %s4298_s20 = sld [smem:[#allocation26_spill]]  ;;  %s4299_s18 = smov %s3655_s19 }
0x12d8   : > { %p33_p6 = scmp.ge.s32.totalorder %s4296_s21, 4   ;;  %s4300_s19 = smov %s4297_s30 }
0x12da   :  { %35 = sbr.rel (!%p33_p6) target bundleno = 15 (0xf), region = 168 }
0x12e1   :  { %2488 = vsyncpa [#allocation3], 1 }
0x12e2   :  { %2490 = vsyncpa [#allocation3 + $0x1], 1 }
0x12e3   :  { %2491 = vsyncpa [#allocation6], 1 }
0x12e4   :  { %2492 = vsyncpa [#allocation9], 1 }
0x12e5   :  { %2493 = vsyncpa [#allocation12], 1 }
0x12e6   :  { %2494 = vsyncpa [#allocation4], 1 }
0x12e7   :  { %2496 = vsyncpa [#allocation4 + $0x1], 1 }
0x12e8   :  { %2497 = vsyncpa [#allocation15], 1 }
0x12e9   :  { %2499 = vsyncpa [#allocation15 + $0x1], 1 }

</bundles_post_ra>
